<compile_context>
chip_gen: v5e
topology: v5e:2x2
jax: 0.10.0
libtpu: 0.0.40
codegen_flags: <defaults>
</compile_context>

<pallas_src>
import functools

import jax
import jax.numpy as jnp
from jax.experimental import pallas as pl
from jax.experimental.pallas import tpu as pltpu


# --------------------------------------------------------------------------- #
# Kernel 1: conv_sig (1x1 -> ReLU -> 1x1 -> softmax over heads) fused with the #
# exact fold of the attention into the conv_mh weights:                        #
#     W_eff[b] = sum_h attn[b, h] * W_mh[h]                                    #
# Output: (B, Cout*9*Cin) flat, ordered (cout, tap, cin) — the matmul LHS of   #
# kernel 2.                                                                    #
# --------------------------------------------------------------------------- #
def _attn_fold_kernel(emb_ref, w1_ref, w2_ref, wm_ref, weff_ref):
    emb = emb_ref[...].astype(jnp.float32)
    h = jnp.maximum(
        jnp.dot(emb, w1_ref[...], preferred_element_type=jnp.float32), 0.0)
    s = jnp.dot(h, w2_ref[...], preferred_element_type=jnp.float32)     # (B, NH)
    s = s - jnp.max(s, axis=-1, keepdims=True)                          # softmax
    e = jnp.exp(s)
    attn = e / jnp.sum(e, axis=-1, keepdims=True)
    # fold: (B, NH) @ (NH, Cout*9*Cin) -> per-batch effective 3x3 weights.
    weff = jnp.dot(attn, wm_ref[...], preferred_element_type=jnp.float32)
    # bf16 storage is intentional: weff is an MXU operand in kernel 2; the
    # ~2^-9 relative rounding is well inside tolerance (documented tradeoff).
    weff_ref[...] = weff.astype(weff_ref.dtype)


# --------------------------------------------------------------------------- #
# Kernel 2: row-tiled 3x3 conv (pad=1, no bias) with the folded weights.       #
#   xm_ref : (1, Cin, TH,  W+2)  main rows of the padded activation tile       #
#   xh_ref : (1, Cin, 8,   W+2)  halo block (next 8 padded rows; first 2 used) #
#   wf_ref : (1, Cout, 9*Cin)    per-batch folded weights (resident across r)  #
#   o_ref  : (1, Cout, TH*W)     output tile, cropped & flattened, x.dtype     #
#   rhs_ref: (9*Cin, TH*W)       VMEM scratch: tap-stacked matmul RHS          #
# --------------------------------------------------------------------------- #
def _folded_conv3x3_kernel(xm_ref, xh_ref, wf_ref, o_ref, rhs_ref, *, TH, W, cin):
    # (Cin, TH+2, W+2): main rows + first 2 halo rows.
    xall = jnp.concatenate([xm_ref[0], xh_ref[0][:, 0:2, :]], axis=1)
    # 3 dx-shifted slabs reused over dy: pay the lane shift 3x, not 9x.
    xd = [xall[:, :, dx:dx + W] for dx in range(3)]                 # (Cin, TH+2, W)
    for dy in range(3):
        for dx in range(3):
            tap = 3 * dy + dx
            rhs_ref[tap * cin:(tap + 1) * cin, :] = (
                xd[dx][:, dy:dy + TH, :].reshape(cin, TH * W))
    # One MXU dot with contraction depth K = 9*Cin (vs 9 dots with K = Cin).
    out = jnp.dot(wf_ref[0], rhs_ref[...], preferred_element_type=jnp.float32)
    o_ref[0] = out.astype(o_ref.dtype)


# --------------------------------------------------------------------------- #
# Parameter preparation (once, from torch-layout weights)                      #
# --------------------------------------------------------------------------- #
def prepare_dalayer_params(w_mh_torch, w_sig1_torch, w_sig2_torch, num_head):
    """w_mh_torch  : (NH*C, Cin, 3, 3)  conv_mh.weight   (out index = h*C + c)
       w_sig1_torch: (E//r, E, 1, 1)    conv_sig[0].weight
       w_sig2_torch: (NH, E//r, 1, 1)   conv_sig[2].weight"""
    oc, cin, kh, kw = w_mh_torch.shape
    c = oc // num_head
    wm = w_mh_torch.reshape(num_head, c, cin, kh, kw)
    wm = jnp.transpose(wm, (0, 1, 3, 4, 2))            # (NH, C, kh, kw, Cin)
    wm = wm.reshape(num_head, c * kh * kw * cin)       # columns: (cout, tap, cin)
    return {
        "wm": wm.astype(jnp.float32),                  # fold done in f32
        "w_sig1": jnp.transpose(w_sig1_torch[:, :, 0, 0]).astype(jnp.float32),
        "w_sig2": jnp.transpose(w_sig2_torch[:, :, 0, 0]).astype(jnp.float32),
    }


def _pick_row_tile(H, W, cin, itemsize=2, rhs_budget_bytes=12 << 20):
    """Largest row tile TH (multiple of 8, divides H, lane-dense output) whose
    tap-stacked RHS (9*Cin, TH*W) stays under `rhs_budget_bytes` of VMEM."""
    valid = [th for th in range(8, H + 1, 8)
             if H % th == 0 and ((th * W) % 128 == 0 or th == H)]
    if not valid:
        raise ValueError("H must be a multiple of 8 (pre-pad the input if needed).")
    fitting = [th for th in valid
               if 9 * cin * th * W * itemsize <= rhs_budget_bytes]
    return max(fitting) if fitting else min(valid)


# --------------------------------------------------------------------------- #
# Forward: DALayer.forward(x, index_emb), x in NCHW like the torch module.     #
# --------------------------------------------------------------------------- #
def dalayer_forward(x, index_emb, params, *, row_tile=None):
    B, C, H, W = x.shape
    wm = params["wm"]                                  # (NH, Cout*9*Cin) f32
    cin = C
    cout = wm.shape[1] // (9 * cin)                    # == C for DALayer
    Wp = W + 2

    # ---- kernel 1: attention + exact weight fold (single tiny pallas_call) --
    weff_flat = pl.pallas_call(
        _attn_fold_kernel,
        out_shape=jax.ShapeDtypeStruct((B, wm.shape[1]), x.dtype),
    )(index_emb.astype(jnp.float32), params["w_sig1"], params["w_sig2"], wm)
    weff = weff_flat.reshape(B, cout, 9 * cin)         # contiguous reshape, free

    # ---- kernel 2: row-tiled folded 3x3 conv ---------------------------------
    TH = row_tile if row_tile is not None else _pick_row_tile(
        H, W, cin, jnp.dtype(x.dtype).itemsize)
    if H % TH != 0 or TH % 8 != 0:
        raise ValueError(f"row tile {TH} must be a multiple of 8 dividing H={H}")
    if (TH * W) % 128 != 0 and TH != H:
        raise ValueError("TH*W must be a multiple of 128 for the lane-dense output")
    nr = H // TH

    # Zero-pad once in HBM: 1 row/col of conv padding plus 6 extra bottom rows
    # so the 8-row halo block of the last tile stays in bounds (this is what
    # fixes the previous version's OOB flattened slice, by construction).
    # TODO(synk): drop this HBM pad pass by DMAing unpadded rows manually and
    # zeroing the 1-row/1-col halo in VMEM (biggest relative win on v5e).
    xpad = jnp.pad(x, ((0, 0), (0, 0), (1, 7), (1, 1)))    # (B, Cin, H+8, W+2)

    out_flat = pl.pallas_call(
        functools.partial(_folded_conv3x3_kernel, TH=TH, W=W, cin=cin),
        out_shape=jax.ShapeDtypeStruct((B, cout, H * W), x.dtype),
        grid=(B, nr),
        in_specs=[
            # main TH rows of this tile
            pl.BlockSpec((1, cin, TH, Wp), lambda b, r: (b, 0, r, 0)),
            # 8-row halo: same HBM array, index_map points one tile ahead
            pl.BlockSpec((1, cin, 8, Wp),
                         lambda b, r: (b, 0, (r + 1) * (TH // 8), 0)),
            # folded weights: same block for every r -> resident per image
            pl.BlockSpec((1, cout, 9 * cin), lambda b, r: (b, 0, 0)),
        ],
        out_specs=pl.BlockSpec((1, cout, TH * W), lambda b, r: (b, 0, r)),
        scratch_shapes=[pltpu.VMEM((9 * cin, TH * W), x.dtype)],
        compiler_params=pltpu.CompilerParams(
            dimension_semantics=("parallel", "parallel"),
            vmem_limit_bytes=48 * 1024 * 1024,
        ),
    )(xpad, xpad, weff)

    # (B, Cout, H*W) -> (B, Cout, H, W): metadata-only, no extra HBM pass.
    return out_flat.reshape(B, cout, H, W)


# --------------------------------------------------------------------------- #
# Pure-JAX reference mirroring the torch forward (multi-head path, no fold)    #
# --------------------------------------------------------------------------- #
def dalayer_reference(x, index_emb, w_mh_torch, w_sig1_torch, w_sig2_torch,
                      num_head):
    B, C, H, W = x.shape
    y = jax.lax.conv_general_dilated(
        x.astype(jnp.float32), w_mh_torch.astype(jnp.float32),
        window_strides=(1, 1), padding="SAME",
        dimension_numbers=("NCHW", "OIHW", "NCHW"),
        precision=jax.lax.Precision.HIGHEST)
    h = jnp.maximum(index_emb @ jnp.transpose(w_sig1_torch[:, :, 0, 0]), 0.0)
    attn = jax.nn.softmax(h @ jnp.transpose(w_sig2_torch[:, :, 0, 0]), axis=-1)
    y5 = y.reshape(B, num_head, C, H, W)
    return jnp.sum(y5 * attn[:, :, None, None, None], axis=1)


if __name__ == "__main__":
    B, C, H, W = 2, 8, 16, 16
    num_head = 3                       # DALayer default num_head
    type_emb_dim = 8
    reduction = 4                      # DALayer default reduction

    key = jax.random.PRNGKey(0)
    kx, ke, k1, k2, k3 = jax.random.split(key, 5)
    x_f32 = jax.random.normal(kx, (B, C, H, W), jnp.float32)           # NCHW
    index_emb = jax.random.normal(ke, (B, type_emb_dim), jnp.float32)
    w_mh = 0.05 * jax.random.normal(k1, (num_head * C, C, 3, 3), jnp.float32)
    w_sig1 = 0.5 * jax.random.normal(
        k2, (type_emb_dim // reduction, type_emb_dim, 1, 1), jnp.float32)
    w_sig2 = 0.5 * jax.random.normal(
        k3, (num_head, type_emb_dim // reduction, 1, 1), jnp.float32)

    # bf16 activation / weight storage; conv accumulates in f32 on the MXU.
    x = x_f32.astype(jnp.bfloat16)
    params = prepare_dalayer_params(w_mh, w_sig1, w_sig2, num_head)

    # row_tile=8 -> 2 row tiles per image: exercises the halo path explicitly.
    fwd = jax.jit(functools.partial(dalayer_forward, row_tile=8))
    out = jax.block_until_ready(fwd(x, index_emb, params))

    ref = dalayer_reference(x.astype(jnp.float32), index_emb,
                            w_mh, w_sig1, w_sig2, num_head)

    assert out.shape == (B, C, H, W), out.shape
    assert bool(jnp.all(jnp.isfinite(out)))
    max_err = float(jnp.max(jnp.abs(out.astype(jnp.float32) - ref)))
    assert max_err < 5e-2, f"max |pallas - reference| = {max_err}"
    print("KERNEL_OK")
</pallas_src>

<mosaic_0001>
module attributes {stable_mosaic.version = 11 : i64} {
  func.func @_attn_fold_kernel(%arg0: memref<2x8xf32, #tpu.memory_space<vmem>>, %arg1: memref<8x2xf32, #tpu.memory_space<vmem>>, %arg2: memref<2x3xf32, #tpu.memory_space<vmem>>, %arg3: memref<3x576xf32, #tpu.memory_space<vmem>>, %arg4: memref<2x576xbf16, #tpu.memory_space<vmem>>) attributes {dimension_semantics = [], scalar_prefetch = 0 : i64, scratch_operands = 0 : i64, tpu.core_type = #tpu.core_type<tc>} {
    %c0 = arith.constant 0 : index
    %c0_0 = arith.constant 0 : index
    %0 = vector.load %arg0[%c0, %c0_0] : memref<2x8xf32, #tpu.memory_space<vmem>>, vector<2x8xf32>
    %c0_1 = arith.constant 0 : index
    %c0_2 = arith.constant 0 : index
    %1 = vector.load %arg1[%c0_1, %c0_2] : memref<8x2xf32, #tpu.memory_space<vmem>>, vector<8x2xf32>
    %cst = arith.constant dense<0.000000e+00> : vector<2x2xf32>
    %2 = tpu.matmul %0, %1, %cst {dimension_numbers = #tpu.dot_dimension_numbers<[1], [0], [0], [1], [0, 0, 1, 1], [], []>} : vector<2x8xf32>, vector<8x2xf32>, vector<2x2xf32> -> vector<2x2xf32>
    %cst_3 = arith.constant 0.000000e+00 : f32
    %3 = vector.broadcast %cst_3 : f32 to vector<2x2xf32>
    %4 = arith.maximumf %2, %3 : vector<2x2xf32>
    %c0_4 = arith.constant 0 : index
    %c0_5 = arith.constant 0 : index
    %5 = vector.load %arg2[%c0_4, %c0_5] : memref<2x3xf32, #tpu.memory_space<vmem>>, vector<2x3xf32>
    %cst_6 = arith.constant dense<0.000000e+00> : vector<2x3xf32>
    %6 = tpu.matmul %4, %5, %cst_6 {dimension_numbers = #tpu.dot_dimension_numbers<[1], [0], [0], [1], [0, 0, 1, 1], [], []>} : vector<2x2xf32>, vector<2x3xf32>, vector<2x3xf32> -> vector<2x3xf32>
    %cst_7 = arith.constant dense<0xFF800000> : vector<2xf32>
    %7 = vector.multi_reduction <maximumf>, %6, %cst_7 [1] : vector<2x3xf32> to vector<2xf32>
    %8 = vector.shape_cast %7 : vector<2xf32> to vector<2x1xf32>
    %9 = vector.broadcast %8 : vector<2x1xf32> to vector<2x3xf32>
    %10 = arith.subf %6, %9 : vector<2x3xf32>
    %11 = math.exp %10 : vector<2x3xf32>
    %cst_8 = arith.constant dense<0.000000e+00> : vector<2xf32>
    %12 = vector.multi_reduction <add>, %11, %cst_8 [1] : vector<2x3xf32> to vector<2xf32>
    %13 = vector.shape_cast %12 : vector<2xf32> to vector<2x1xf32>
    %14 = vector.broadcast %13 : vector<2x1xf32> to vector<2x3xf32>
    %15 = arith.divf %11, %14 : vector<2x3xf32>
    %c0_9 = arith.constant 0 : index
    %c0_10 = arith.constant 0 : index
    %16 = vector.load %arg3[%c0_9, %c0_10] : memref<3x576xf32, #tpu.memory_space<vmem>>, vector<3x576xf32>
    %cst_11 = arith.constant dense<0.000000e+00> : vector<2x576xf32>
    %17 = tpu.matmul %15, %16, %cst_11 {dimension_numbers = #tpu.dot_dimension_numbers<[1], [0], [0], [1], [0, 0, 1, 1], [], []>} : vector<2x3xf32>, vector<3x576xf32>, vector<2x576xf32> -> vector<2x576xf32>
    %18 = arith.truncf %17 : vector<2x576xf32> to vector<2x576xbf16>
    %c0_12 = arith.constant 0 : index
    %c0_13 = arith.constant 0 : index
    %19 = vector.load %arg4[%c0_12, %c0_13] : memref<2x576xbf16, #tpu.memory_space<vmem>>, vector<2x576xbf16>
    tpu.vector_store %arg4[%c0_12, %c0_13], %18 {strides = array<i32>} : memref<2x576xbf16, #tpu.memory_space<vmem>>, vector<2x576xbf16>,
    return
  }
}

module attributes {stable_mosaic.version = 11 : i64} {
  func.func @_folded_conv3x3_kernel(%arg0: i32, %arg1: i32, %arg2: memref<1x8x8x18xbf16, #tpu.memory_space<vmem>>, %arg3: memref<1x8x8x18xbf16, #tpu.memory_space<vmem>>, %arg4: memref<1x8x72xbf16, #tpu.memory_space<vmem>>, %arg5: memref<1x8x128xbf16, #tpu.memory_space<vmem>>, %arg6: memref<72x128xbf16, #tpu.memory_space<vmem>>) attributes {dimension_semantics = [#tpu.dimension_semantics<parallel>, #tpu.dimension_semantics<parallel>], iteration_bounds = array<i64: 2, 2>, scalar_prefetch = 0 : i64, scratch_operands = 1 : i64, tpu.core_type = #tpu.core_type<tc>, window_params = [{transform_indices = @transform_0, window_bounds = array<i64: 1, 8, 8, 18>}, {transform_indices = @transform_1, window_bounds = array<i64: 1, 8, 8, 18>}, {transform_indices = @transform_2, window_bounds = array<i64: 1, 8, 72>}, {transform_indices = @transform_3, window_bounds = array<i64: 1, 8, 128>}]} {
    %c0 = arith.constant 0 : index
    %c0_0 = arith.constant 0 : index
    %c0_1 = arith.constant 0 : index
    %c0_2 = arith.constant 0 : index
    %0 = vector.load %arg2[%c0, %c0_0, %c0_1, %c0_2] : memref<1x8x8x18xbf16, #tpu.memory_space<vmem>>, vector<1x8x8x18xbf16>
    %1 = vector.shape_cast %0 : vector<1x8x8x18xbf16> to vector<8x8x18xbf16>
    %c0_3 = arith.constant 0 : index
    %c0_4 = arith.constant 0 : index
    %c0_5 = arith.constant 0 : index
    %c0_6 = arith.constant 0 : index
    %2 = vector.load %arg3[%c0_3, %c0_4, %c0_5, %c0_6] : memref<1x8x8x18xbf16, #tpu.memory_space<vmem>>, vector<1x8x8x18xbf16>
    %3 = vector.shape_cast %2 : vector<1x8x8x18xbf16> to vector<8x8x18xbf16>
    %4 = vector.extract_strided_slice %3 {offsets = [0, 0, 0], sizes = [8, 2, 18], strides = [1, 1, 1]} : vector<8x8x18xbf16> to vector<8x2x18xbf16>
    %5 = tpu.concatenate %1, %4 in 1 : vector<8x8x18xbf16>, vector<8x2x18xbf16> -> vector<8x10x18xbf16>
    %6 = vector.extract_strided_slice %5 {offsets = [0, 0, 0], sizes = [8, 10, 16], strides = [1, 1, 1]} : vector<8x10x18xbf16> to vector<8x10x16xbf16>
    %7 = vector.extract_strided_slice %5 {offsets = [0, 0, 1], sizes = [8, 10, 16], strides = [1, 1, 1]} : vector<8x10x18xbf16> to vector<8x10x16xbf16>
    %8 = vector.extract_strided_slice %5 {offsets = [0, 0, 2], sizes = [8, 10, 16], strides = [1, 1, 1]} : vector<8x10x18xbf16> to vector<8x10x16xbf16>
    %9 = vector.extract_strided_slice %6 {offsets = [0, 0, 0], sizes = [8, 8, 16], strides = [1, 1, 1]} : vector<8x10x16xbf16> to vector<8x8x16xbf16>
    %10 = vector.shape_cast %9 : vector<8x8x16xbf16> to vector<8x128xbf16>
    %c0_7 = arith.constant 0 : index
    %c0_8 = arith.constant 0 : index
    %11 = vector.load %arg6[%c0_7, %c0_8] : memref<72x128xbf16, #tpu.memory_space<vmem>>, vector<8x128xbf16>
    tpu.vector_store %arg6[%c0_7, %c0_8], %10 {strides = array<i32>} : memref<72x128xbf16, #tpu.memory_space<vmem>>, vector<8x128xbf16>,
    %12 = vector.extract_strided_slice %7 {offsets = [0, 0, 0], sizes = [8, 8, 16], strides = [1, 1, 1]} : vector<8x10x16xbf16> to vector<8x8x16xbf16>
    %13 = vector.shape_cast %12 : vector<8x8x16xbf16> to vector<8x128xbf16>
    %c8 = arith.constant 8 : index
    %c0_9 = arith.constant 0 : index
    %14 = vector.load %arg6[%c8, %c0_9] : memref<72x128xbf16, #tpu.memory_space<vmem>>, vector<8x128xbf16>
    tpu.vector_store %arg6[%c8, %c0_9], %13 {strides = array<i32>} : memref<72x128xbf16, #tpu.memory_space<vmem>>, vector<8x128xbf16>,
    %15 = vector.extract_strided_slice %8 {offsets = [0, 0, 0], sizes = [8, 8, 16], strides = [1, 1, 1]} : vector<8x10x16xbf16> to vector<8x8x16xbf16>
    %16 = vector.shape_cast %15 : vector<8x8x16xbf16> to vector<8x128xbf16>
    %c16 = arith.constant 16 : index
    %c0_10 = arith.constant 0 : index
    %17 = vector.load %arg6[%c16, %c0_10] : memref<72x128xbf16, #tpu.memory_space<vmem>>, vector<8x128xbf16>
    tpu.vector_store %arg6[%c16, %c0_10], %16 {strides = array<i32>} : memref<72x128xbf16, #tpu.memory_space<vmem>>, vector<8x128xbf16>,
    %18 = vector.extract_strided_slice %6 {offsets = [0, 1, 0], sizes = [8, 8, 16], strides = [1, 1, 1]} : vector<8x10x16xbf16> to vector<8x8x16xbf16>
    %19 = vector.shape_cast %18 : vector<8x8x16xbf16> to vector<8x128xbf16>
    %c24 = arith.constant 24 : index
    %c0_11 = arith.constant 0 : index
    %20 = vector.load %arg6[%c24, %c0_11] : memref<72x128xbf16, #tpu.memory_space<vmem>>, vector<8x128xbf16>
    tpu.vector_store %arg6[%c24, %c0_11], %19 {strides = array<i32>} : memref<72x128xbf16, #tpu.memory_space<vmem>>, vector<8x128xbf16>,
    %21 = vector.extract_strided_slice %7 {offsets = [0, 1, 0], sizes = [8, 8, 16], strides = [1, 1, 1]} : vector<8x10x16xbf16> to vector<8x8x16xbf16>
    %22 = vector.shape_cast %21 : vector<8x8x16xbf16> to vector<8x128xbf16>
    %c32 = arith.constant 32 : index
    %c0_12 = arith.constant 0 : index
    %23 = vector.load %arg6[%c32, %c0_12] : memref<72x128xbf16, #tpu.memory_space<vmem>>, vector<8x128xbf16>
    tpu.vector_store %arg6[%c32, %c0_12], %22 {strides = array<i32>} : memref<72x128xbf16, #tpu.memory_space<vmem>>, vector<8x128xbf16>,
    %24 = vector.extract_strided_slice %8 {offsets = [0, 1, 0], sizes = [8, 8, 16], strides = [1, 1, 1]} : vector<8x10x16xbf16> to vector<8x8x16xbf16>
    %25 = vector.shape_cast %24 : vector<8x8x16xbf16> to vector<8x128xbf16>
    %c40 = arith.constant 40 : index
    %c0_13 = arith.constant 0 : index
    %26 = vector.load %arg6[%c40, %c0_13] : memref<72x128xbf16, #tpu.memory_space<vmem>>, vector<8x128xbf16>
    tpu.vector_store %arg6[%c40, %c0_13], %25 {strides = array<i32>} : memref<72x128xbf16, #tpu.memory_space<vmem>>, vector<8x128xbf16>,
    %27 = vector.extract_strided_slice %6 {offsets = [0, 2, 0], sizes = [8, 8, 16], strides = [1, 1, 1]} : vector<8x10x16xbf16> to vector<8x8x16xbf16>
    %28 = vector.shape_cast %27 : vector<8x8x16xbf16> to vector<8x128xbf16>
    %c48 = arith.constant 48 : index
    %c0_14 = arith.constant 0 : index
    %29 = vector.load %arg6[%c48, %c0_14] : memref<72x128xbf16, #tpu.memory_space<vmem>>, vector<8x128xbf16>
    tpu.vector_store %arg6[%c48, %c0_14], %28 {strides = array<i32>} : memref<72x128xbf16, #tpu.memory_space<vmem>>, vector<8x128xbf16>,
    %30 = vector.extract_strided_slice %7 {offsets = [0, 2, 0], sizes = [8, 8, 16], strides = [1, 1, 1]} : vector<8x10x16xbf16> to vector<8x8x16xbf16>
    %31 = vector.shape_cast %30 : vector<8x8x16xbf16> to vector<8x128xbf16>
    %c56 = arith.constant 56 : index
    %c0_15 = arith.constant 0 : index
    %32 = vector.load %arg6[%c56, %c0_15] : memref<72x128xbf16, #tpu.memory_space<vmem>>, vector<8x128xbf16>
    tpu.vector_store %arg6[%c56, %c0_15], %31 {strides = array<i32>} : memref<72x128xbf16, #tpu.memory_space<vmem>>, vector<8x128xbf16>,
    %33 = vector.extract_strided_slice %8 {offsets = [0, 2, 0], sizes = [8, 8, 16], strides = [1, 1, 1]} : vector<8x10x16xbf16> to vector<8x8x16xbf16>
    %34 = vector.shape_cast %33 : vector<8x8x16xbf16> to vector<8x128xbf16>
    %c64 = arith.constant 64 : index
    %c0_16 = arith.constant 0 : index
    %35 = vector.load %arg6[%c64, %c0_16] : memref<72x128xbf16, #tpu.memory_space<vmem>>, vector<8x128xbf16>
    tpu.vector_store %arg6[%c64, %c0_16], %34 {strides = array<i32>} : memref<72x128xbf16, #tpu.memory_space<vmem>>, vector<8x128xbf16>,
    %c0_17 = arith.constant 0 : index
    %c0_18 = arith.constant 0 : index
    %c0_19 = arith.constant 0 : index
    %36 = vector.load %arg4[%c0_17, %c0_18, %c0_19] : memref<1x8x72xbf16, #tpu.memory_space<vmem>>, vector<1x8x72xbf16>
    %37 = vector.shape_cast %36 : vector<1x8x72xbf16> to vector<8x72xbf16>
    %c0_20 = arith.constant 0 : index
    %c0_21 = arith.constant 0 : index
    %38 = vector.load %arg6[%c0_20, %c0_21] : memref<72x128xbf16, #tpu.memory_space<vmem>>, vector<72x128xbf16>
    %cst = arith.constant dense<0.000000e+00> : vector<8x128xf32>
    %39 = tpu.matmul %37, %38, %cst {dimension_numbers = #tpu.dot_dimension_numbers<[1], [0], [0], [1], [0, 0, 1, 1], [], []>} : vector<8x72xbf16>, vector<72x128xbf16>, vector<8x128xf32> -> vector<8x128xf32>
    %40 = arith.truncf %39 : vector<8x128xf32> to vector<8x128xbf16>
    %c0_22 = arith.constant 0 : index
    %c0_23 = arith.constant 0 : index
    %c0_24 = arith.constant 0 : index
    %41 = vector.load %arg5[%c0_22, %c0_23, %c0_24] : memref<1x8x128xbf16, #tpu.memory_space<vmem>>, vector<1x8x128xbf16>
    %42 = vector.shape_cast %41 : vector<1x8x128xbf16> to vector<8x128xbf16>
    %43 = vector.shape_cast %40 : vector<8x128xbf16> to vector<1x8x128xbf16>
    tpu.vector_store %arg5[%c0_22, %c0_23, %c0_24], %43 {strides = array<i32>} : memref<1x8x128xbf16, #tpu.memory_space<vmem>>, vector<1x8x128xbf16>,
    return
  }
  func.func @transform_0(%arg0: i32, %arg1: i32) -> (i32, i32, i32, i32) {
    %c0_i32 = arith.constant 0 : i32
    %c0_i32_0 = arith.constant 0 : i32
    %c0_i32_1 = arith.constant 0 : i32
    return %arg0, %c0_i32, %arg1, %c0_i32_0 : i32, i32, i32, i32
  }
  func.func @transform_1(%arg0: i32, %arg1: i32) -> (i32, i32, i32, i32) {
    %c1_i32 = arith.constant 1 : i32
    %0 = arith.addi %arg1, %c1_i32 : i32
    %c1_i32_0 = arith.constant 1 : i32
    %1 = arith.muli %0, %c1_i32_0 : i32
    %c0_i32 = arith.constant 0 : i32
    %c0_i32_1 = arith.constant 0 : i32
    %c0_i32_2 = arith.constant 0 : i32
    return %arg0, %c0_i32, %1, %c0_i32_1 : i32, i32, i32, i32
  }
  func.func @transform_2(%arg0: i32, %arg1: i32) -> (i32, i32, i32) {
    %c0_i32 = arith.constant 0 : i32
    %c0_i32_0 = arith.constant 0 : i32
    %c0_i32_1 = arith.constant 0 : i32
    return %arg0, %c0_i32, %c0_i32_0 : i32, i32, i32
  }
  func.func @transform_3(%arg0: i32, %arg1: i32) -> (i32, i32, i32) {
    %c0_i32 = arith.constant 0 : i32
    %c0_i32_0 = arith.constant 0 : i32
    return %arg0, %c0_i32, %arg1 : i32, i32, i32
  }
}

</mosaic_0001>

<bundles_post_ra>
// kernel: dalayer_forward.2
= control target key start
LH: loop header
LB: loop body
LE: loop exit
PB: predicated region body
PF: predicated region fallthrough
CT: control target
= control target key end

     0   :  { %9 = vsyncpa [#allocation3], 0  ;;  %s326_s18 = smov [#allocation2]   ;;  %s375_s0 = inlined_call_operand.vmem [shape: f32[2,8], index: 0, kind: input, shape index: {}]   ;;  %s376_s1 = inlined_call_operand.vmem [shape: f32[8,2], index: 1, kind: input, shape index: {}]   ;;  %s377_s2 = inlined_call_operand.vmem [shape: f32[2,3], index: 2, kind: input, shape index: {}]   ;;  %s378_s3 = inlined_call_operand.hbm [shape: f32[3,576], index: 3, kind: input, shape index: {}]   ;;  %s379_s4 = inlined_call_operand.vmem [shape: bf16[2,576], index: 4, kind: output, shape index: {}]  }
   0x1   :  { %s21_s17 = sshll.u32 %s378_s3, 4  ;;  %s23_s19 = sshll.u32 %s326_s18, 4  ;;  %s22_s17 = int_to_ptr.hbm [resolvable:$true] %s21_s17  ;;  %s24_s19 = int_to_ptr.vmem [resolvable:$true] %s23_s19 }
   0x2   :  { %26 = dma.hbm_to_vmem [thread:$0]  %s22_s17, 320, %s24_s19, [#allocation3]  }
   0x3   :  { %324 = dma.done.wait [#allocation3], 320  }
   0x4   :  { %325 = vsyncadd [#allocation3], 4294966976  ;;  %vm33_vm0 = vcmask 64512   ;;  %v32_v0 = vld [vmem:[%s376_s1] sm:$0xff]  ;;  %vm63_vm1 = vcmask 1041408   ;;  %vm59_vm2 = vcmask 15360  }
   0x5   :  { %v31_v1 = vld [vmem:[%s375_s0] sm:$0x3]  ;;  %52 = vmatpush.msra.mxu0 %v32_v0  ;;  %vm87_vm3 = vcmask 17408   ;;  %v112_v12 = vld [vmem:[#allocation2] sm:$0x77]  ;;  %vm132_vm4 = vcmask 1042432  }
   0x6   :  { %282 = vmatmul.msk.f32.vlgmr.msra.gmra.mxu0 %vm33_vm0, %v31_v1  ;;  %v58_v2 = vld [vmem:[%s377_s2] sm:$0x3]  ;;  %v113_v13 = vld [vmem:[#allocation2 + $0x8] sm:$0x77]  ;;  %118 = vst [vmem:[#allocation1] ss:$2 sm:$0xff] %v112_v12 }
   0x7   :  { %283 = vmatpush.msk.msra.mxu1 %vm63_vm1, %v58_v2  ;;  %120 = vst [vmem:[#allocation1 + $0x10] ss:$2 sm:$0xff] %v113_v13  ;;  %v114_v18 = vld [vmem:[#allocation2 + $0x10] sm:$0x7]  ;;  %vm128_vm9 = vcmask 23552   ;;  %vm269_vm10 = vcmask 1041409  }
   0x8   :  { %122 = vst [vmem:[#allocation1 + $0x20] ss:$2 sm:$0xff] %v114_v18  ;;  %vm254_vm11 = vcmask 1040384   ;;  %vm271_vm13 = vcmask 1042434   ;;  %vm260_vm15 = vcmask 1043459   ;;  %vm264_vm0 = vcmask 1044483  }
   0x9   :  { %vm270_vm12 = vmor %vm269_vm10, %vm254_vm11 }
   0xa   :  { %vm272_vm14 = vmor %vm271_vm13, %vm270_vm12 }
   0xd   :  { %v123_v14 = vld.sshfl [vmem:[#allocation1] sm:$0xff pattern:$0x75316420]  ;;  %v124_v15 = vld.sshfl [vmem:[#allocation1 + $0x8] sm:$0xff pattern:$0x75316420] }
   0xe   :  { %285 = vmatpush.msk.msra.mxu2 %vm132_vm4, %v123_v14  ;;  %v125_v16 = vld.sshfl [vmem:[#allocation1 + $0x10] sm:$0xff pattern:$0x75316420]  ;;  %287 = vmatpush.msk.msra.mxu3 %vm132_vm4, %v124_v15  ;;  %v126_v17 = vld.sshfl [vmem:[#allocation1 + $0x18] sm:$0xff pattern:$0x75316420] }
   0xf   :  { %289 = vmatpush.msk.msrb.mxu0 %vm132_vm4, %v125_v16  ;;  %291 = vmatpush.msk.msrb.mxu1 %vm132_vm4, %v126_v17  ;;  %v127_v19 = vld.sshfl [vmem:[#allocation1 + $0x20] sm:$0xff pattern:$0x75316420] }
  0x10   :  { %293 = vmatpush.msk.msrb.mxu2 %vm132_vm4, %v127_v19 }
  0x83   :  { %v54_v3 = vpop.f32.mrf.mxu0 }
  0x84   :  { %v57_v4 = vmax.f32 %v54_v3, 0.0 }
  0x86   :  { %284 = vmatmul.msk.f32.vlgmr.msra.gmra.mxu1 %vm59_vm2, %v57_v4  ;;  %vm273_vm2 = vmor %vm260_vm15, %vm272_vm14 }
 0x103   :  { %v84_v5 = vpop.f32.mrf.mxu1 }
 0x104   :  { %v88_v6 = vsel %vm87_vm3, %v84_v5, -inf }
 0x105   :  { %89 = vmax.xlane.f32.xlu0 %v88_v6 }
 0x178   :  { %v90_v7 = vpop.xlane.xlu0 %89 }
 0x179   :  { %v91_v8 = vsub.f32 %v84_v5, %v90_v7 }
 0x17b   :  { %v92_v9 = vmul.f32 1.442695, %v91_v8 }
 0x17d   :  { %296 = vpow2.f32 %v92_v9 }
 0x183   :  { %v297_v10 = vpop.eup %296 }
 0x184   :  { %v94_v11 = vsel %vm87_vm3, %v297_v10, 0.0  ;;  %vm274_vm3 = vcmask 520196  }
 0x185   :  { %95 = vadd.xlane.f32.xlu0 %v94_v11 }
 0x1f8   :  { %v96_v20 = vpop.xlane.xlu0 %95 }
 0x1f9   :  { %298 = vrcp.f32 %v96_v20  ;;  %v108_v24 = vand.u32 2147483648, %v96_v20  ;;  %v106_v26 = vand.u32 2147483647, %v96_v20  ;;  %vm102_vm6 = vweird.f32 %v96_v20 }
 0x1fb   :  { %v109_v28 = vor.u32 1.1754944e-38, %v108_v24  ;;  %vm107_vm8 = vcmp.eq.f32.partialorder %v106_v26, 8.507059e+37 }
 0x1ff   :  { %v299_v21 = vpop.eup %298 }
 0x200   :  { %v98_v22 = vmul.f32 %v299_v21, %v96_v20  ;;  %vm103_vm5 = vweird.f32 %v299_v21 }
 0x201   :  { %vm104_vm7 = vmor %vm102_vm6, %vm103_vm5 }
 0x202   :  { %v99_v23 = vsub.f32 1.0, %v98_v22  ;;  %vm275_vm5 = vmor %vm274_vm3, %vm273_vm2 }
 0x204   :  { %v100_v25 = vmul.f32 %v299_v21, %v99_v23 }
 0x206   :  { %v101_v27 = vadd.f32 %v299_v21, %v100_v25 }
 0x208   :  { %v105_v29 = vsel %vm104_vm7, %v299_v21, %v101_v27 }
 0x209   :  { %v110_v30 = vsel %vm107_vm8, %v109_v28, %v105_v29 }
 0x20a   :  { %v111_v31 = vmul.f32 %v297_v10, %v110_v30 }
 0x20c   :  { %286 = vmatmul.msk.f32.vlgmr.msra.gmra.mxu2 %vm128_vm9, %v111_v31  ;;  %288 = vmatmul.msk.f32.vlgmr.msra.gmra.mxu3 %vm128_vm9, %v111_v31 }
 0x20d   :  { %290 = vmatmul.msk.f32.vlgmr.msrb.gmra.mxu0 %vm128_vm9, %v111_v31  ;;  %292 = vmatmul.msk.f32.vlgmr.msrb.gmra.mxu1 %vm128_vm9, %v111_v31 }
 0x214   :  { %294 = vmatmul.msk.f32.vlgmr.msrb.gmra.mxu2 %vm128_vm9, %v111_v31 }
 0x28a   :  { %v200_v35 = vpop.f32.mrf.mxu0  ;;  %v220_v36 = vpop.f32.mrf.mxu1 }
 0x28b   :  { %v244_v37 = vpack.c.bf16 %v220_v36, %v200_v35 }
 0x28d   :  { %v251_v41 = vrot.slane %v244_v37, 1  ;;  %v250_v45 = vrot.slane %v244_v37, 6 }
 0x28f   :  { %v160_v32 = vpop.f32.mrf.mxu2  ;;  %v180_v33 = vpop.f32.mrf.mxu3 }
 0x290   :  { %v243_v34 = vpack.c.bf16 %v180_v33, %v160_v32 }
 0x292   :  { %v249_v38 = vrot.slane %v243_v34, 3 }
 0x294   :  { %v257_v42 = vsel %vm254_vm11, %v243_v34, %v249_v38 }
 0x295   :  { %v259_v47 = vsel %vm63_vm1, %v257_v42, %v250_v45 }
 0x297   :  { %v240_v39 = vpop.f32.mrf.mxu2 }
 0x298   :  { %v245_v40 = vpack.c.bf16 %v240_v39, %v240_v39 }
 0x29a   :  { %v252_v43 = vrot.slane %v245_v40, 4  ;;  %v253_v44 = vrot.slane %v245_v40, 7 }
 0x29c   :  { %v263_v46 = vsel %vm260_vm15, %v251_v41, %v252_v43 }
 0x29d   :  { %v266_v48 = vsel %vm264_vm0, %v263_v46, %v253_v44 }
 0x29e   :  { %v267_v49 = vsel %vm132_vm4, %v259_v47, %v266_v48 }
 0x29f   :  { %276 = vst.msk [vmem:[%s379_s4] sm:$0x1f] %vm275_vm5, %v267_v49 }
 0x2a0   :  { %281 = vsyncpa [#allocation3], 1 }

// kernel: dalayer_forward.3
= control target key start
LH: loop header
LB: loop body
LE: loop exit
PB: predicated region body
PF: predicated region fallthrough
CT: control target
= control target key end

     0   :  { %s2118_s12 = smov 0   ;;  %s2120_s13 = smov 0   ;;  %s3028_s0 = inlined_call_operand.vmem [shape: bf16[2,8,24,18], index: 0, kind: input, shape index: {}, may-alias: {0,1}]   ;;  %s3029_s1 = inlined_call_operand.vmem [shape: bf16[2,8,24,18], index: 1, kind: input, shape index: {}, may-alias: {0,1}]   ;;  %s3030_s2 = inlined_call_operand.vmem [shape: bf16[2,8,72], index: 2, kind: input, shape index: {}]   ;;  %s3031_s3 = inlined_call_operand.vmem [shape: bf16[2,8,256], index: 3, kind: output, shape index: {}]  }
   0x1   :  { %s2122_s14 = smov 0   ;;  %s2124_s15 = smov 0  }
   0x2   :  { %s2126_s16 = smov 0   ;;  %s2128_s17 = smov 0  }
   0x3   :  { %s2130_s18 = smov 0   ;;  %s2132_s19 = smov 0  }
   0x4   :  { %s2134_s20 = smov 0  }
   0x5 LB: > { %s22_s21 = sadd.s32 1, %s2077_s18  ;;  %s25_s22 = sadd.s32 1, %s2081_s19  ;;  %s2085_s20 = sphi %s2134_s20, %s13_s20   ;;  %s2081_s19 = sphi %s2132_s19, %s3041_s19   ;;  %s2077_s18 = sphi %s2130_s18, %s3040_s18   ;;  %s2073_s17 = sphi %s2128_s17, %s3039_s17   ;;  %s2069_s16 = sphi %s2126_s16, %s3038_s16   ;;  %s2065_s15 = sphi %s2124_s15, %s3037_s15   ;;  %s2061_s14 = sphi %s2122_s14, %s3036_s14   ;;  %s2057_s13 = sphi %s2120_s13, %s3035_s13   ;;  %s2053_s12 = sphi %s2118_s12, %s3034_s12  }
   0x6   : > { %p23_p0 = scmp.ge.s32.totalorder %s22_s21, 2  ;;  %p41_p1 = scmp.ne.s32.totalorder %s2065_s15, %s2061_s14 }
   0x7   : > { %p42_p2 = scmp.eq.s32.totalorder %s2085_s20, 0  ;;  %s34_s28 = sadd.s32 1, %s2065_s15 }
   0x8   : > { %s2168_s23 = scalar_select %p23_p0, 0, %s22_s21  }
   0x9   : > { %s3043_s22 = smov (!%p23_p0, %s25_s22), %s2081_s19  ;;  %p2173_p3 = por %p42_p2, %p41_p1 }
   0xa   : > { %p27_p4 = scmp.ge.s32.totalorder %s3043_s22, 2  ;;  %s58_s25 = sadd.s32 1, %s2168_s23 }
   0xb   : > { %s30_s26 = ssub.s32 %s2077_s18, %s2168_s23  ;;  %s60_s27 = ssub.s32 %s22_s21, %s58_s25 }
   0xc   : > { %s3045_s22 = smov (%p27_p4, %s3043_s22), 0  ;;  %p71_p5 = scmp.ne.s32.totalorder %s2057_s13, %s2053_s12 }
   0xd   : > { %s29_s29 = ssub.s32 %s2081_s19, %s3045_s22  ;;  %s64_s30 = sadd.s32 1, %s2057_s13 }
   0xe   : > { %s31_s4 = sor.u32 %s30_s26, %s29_s29  ;;  %s61_s5 = sor.u32 %s60_s27, %s29_s29 }
   0xf   : > { %p32_p6 = scmp.eq.s32.totalorder %s31_s4, 0  ;;  %p62_p7 = scmp.eq.s32.totalorder %s61_s5, 0 }
  0x10   : > { %p2190_p8 = por %p71_p5, %p42_p2  ;;  %p1870_p9 = scmp.ge.s32.totalorder %s2085_s20, 4 }
  0x11   : > { %s2195_s7 = scalar_select %p32_p6, %s2065_s15, %s34_s28  }
  0x12   : > { %s2198_s8 = scalar_select %p62_p7, %s2057_s13, %s64_s30  }
  0x13   : > { %151 = sbr.rel (%p1870_p9) target bundleno = 54 (0x36), region = 16 }
  0x18   : > { %154 = sbr.rel (!%p2173_p3) target bundleno = 39 (0x27), region = 20  ;;  %s156_s9 = sand.u32 (%p2173_p3), 1, %s2065_s15  }
  0x19   : > { %s1931_s10 = smul.u32 (%p2173_p3), 24, %s2081_s19  ;;  %s1871_s11 = sshll.u32 (%p2173_p3), %s156_s9, 5 }
  0x1a   : > { %s158_s29 = scalar_lea.vmem (%p2173_p3), [#allocation3], %s1871_s11 }
  0x1b   : > { %s160_s21 = sadd.s32 (%p2173_p3), %s2077_s18, %s1931_s10 }
  0x1c   : > { %s1872_s25 = sshll.u32 (%p2173_p3), %s160_s21, 2 }
  0x1d   : > { %s162_s28 = scalar_lea.vmem %s3028_s0, %s1872_s25 }
  0x1e   : > { %v179_v0 = vld [vmem:[%s162_s28] sm:$0xf]  ;;  %v181_v1 = vld [vmem:[%s162_s28 + $0xc] sm:$0xf]  ;;  %v183_v2 = vld [vmem:[%s162_s28 + $0x18] sm:$0xf] }
  0x1f   : > { %180 = vst [vmem:[%s158_s29] sm:$0xf] %v179_v0  ;;  %v185_v3 = vld [vmem:[%s162_s28 + $0x24] sm:$0xf]  ;;  %v187_v4 = vld [vmem:[%s162_s28 + $0x30] sm:$0xf] }
  0x20   : > { %182 = vst [vmem:[%s158_s29 + $0x4] sm:$0xf] %v181_v1  ;;  %v189_v5 = vld [vmem:[%s162_s28 + $0x3c] sm:$0xf]  ;;  %v191_v6 = vld [vmem:[%s162_s28 + $0x48] sm:$0xf] }
  0x21   : > { %184 = vst [vmem:[%s158_s29 + $0x8] sm:$0xf] %v183_v2  ;;  %v193_v7 = vld [vmem:[%s162_s28 + $0x54] sm:$0xf] }
  0x22   : > { %186 = vst [vmem:[%s158_s29 + $0xc] sm:$0xf] %v185_v3 }
  0x23   : > { %188 = vst [vmem:[%s158_s29 + $0x10] sm:$0xf] %v187_v4 }
  0x24   : > { %190 = vst [vmem:[%s158_s29 + $0x14] sm:$0xf] %v189_v5 }
  0x25   : > { %192 = vst [vmem:[%s158_s29 + $0x18] sm:$0xf] %v191_v6 }
  0x26   : > { %194 = vst [vmem:[%s158_s29 + $0x1c] sm:$0xf] %v193_v7 }
  0x27 PF: > { %234 = sbr.rel (!%p2190_p8) target bundleno = 54 (0x36), region = 61  ;;  %s236_s24 = sand.u32 (%p2190_p8), 1, %s2057_s13  }
  0x28   : > { %s1781_s30 = smul.u32 (%p2190_p8), 24, %s2081_s19  ;;  %s1873_s4 = sshll.u32 (%p2190_p8), %s236_s24, 5 }
  0x29   : > { %s238_s25 = scalar_lea.vmem (%p2190_p8), [#allocation4], %s1873_s4 }
  0x2a   : > { %s1782_s5 = sadd.s32 (%p2190_p8), %s2077_s18, %s1781_s30 }
  0x2b   : > { %s1874_s9 = sshll.u32 (%p2190_p8), %s1782_s5, 2 }
  0x2c   : > { %s1784_s21 = scalar_lea.vmem %s3029_s1, %s1874_s9 }
  0x2d   : > { %v1875_v8 = vld [vmem:[%s1784_s21 + $0x4] sm:$0xf]  ;;  %v1876_v9 = vld [vmem:[%s1784_s21 + $0x10] sm:$0xf]  ;;  %v1877_v10 = vld [vmem:[%s1784_s21 + $0x1c] sm:$0xf] }
  0x2e   : > { %261 = vst [vmem:[%s238_s25] sm:$0xf] %v1875_v8  ;;  %v1878_v11 = vld [vmem:[%s1784_s21 + $0x28] sm:$0xf]  ;;  %v1879_v12 = vld [vmem:[%s1784_s21 + $0x34] sm:$0xf] }
  0x2f   : > { %263 = vst [vmem:[%s238_s25 + $0x4] sm:$0xf] %v1876_v9  ;;  %v1880_v13 = vld [vmem:[%s1784_s21 + $0x40] sm:$0xf]  ;;  %v1881_v14 = vld [vmem:[%s1784_s21 + $0x4c] sm:$0xf] }
  0x30   : > { %265 = vst [vmem:[%s238_s25 + $0x8] sm:$0xf] %v1877_v10  ;;  %v1882_v15 = vld [vmem:[%s1784_s21 + $0x58] sm:$0xf] }
  0x31   : > { %267 = vst [vmem:[%s238_s25 + $0xc] sm:$0xf] %v1878_v11 }
  0x32   : > { %269 = vst [vmem:[%s238_s25 + $0x10] sm:$0xf] %v1879_v12 }
  0x33   : > { %271 = vst [vmem:[%s238_s25 + $0x14] sm:$0xf] %v1880_v13 }
  0x34   : > { %273 = vst [vmem:[%s238_s25 + $0x18] sm:$0xf] %v1881_v14 }
  0x35   : > { %275 = vst [vmem:[%s238_s25 + $0x1c] sm:$0xf] %v1882_v15 }
  0x36 PF: > { %p1883_p10 = scmp.ge.s32.totalorder %s2085_s20, 1  ;;  %p321_p11 = scmp.lt.s32.totalorder %s2085_s20, 5 }
  0x38   : > { %p322_p12 = pnand %p1883_p10, %p321_p11 }
  0x39   : > { %s328_s6 = sand.u32 (!%p322_p12), 1, %s2061_s14   ;;  %s335_s26 = sand.u32 (!%p322_p12), 1, %s2053_s12  }
  0x3a   : > { %325 = sbr.rel (%p322_p12) target bundleno = 725 (0x2d5), region = 106  ;;  %s1884_s27 = sshll.u32 (!%p322_p12), %s328_s6, 5 }
  0x3b   : > { %s1885_s28 = sshll.u32 (!%p322_p12), %s335_s26, 5  ;;  %s2221_s24 = scalar_lea.vmem (!%p322_p12), [#allocation3], %s1884_s27 }
  0x3c   : > { %s337_s29 = scalar_lea.vmem (!%p322_p12), [#allocation4], %s1885_s28  ;;  %s2089_s12 = smov (!%p322_p12), 127  }
  0x3d   : > { %s2090_s14 = smov (!%p322_p12), 64   ;;  %s2091_s30 = smov (!%p322_p12), 16  }
  0x3e   : > { %s2092_s4 = smov (!%p322_p12), 80   ;;  %s2093_s5 = smov (!%p322_p12), 32  }
  0x3f   : > { %v2087_v16 = vmov 1983009808   ;;  %v1913_v18 = vld [vmem:[%s337_s29] sm:$0xff]   ;;  %v1929_v19 = vld [vmem:[%s337_s29 + $0x10] sm:$0xff]   ;;  %vm423_vm0 = vcmask 1043456   ;;  %vm457_vm1 = vcmask 1047556  }
  0x40   : > { %v460_v17 = vunpack.c.l.s4 %v2087_v16  ;;  %v383_v20 = vld [vmem:[%s2221_s24] sm:$0xf]  ;;  %v384_v21 = vld [vmem:[%s2221_s24 + $0x4] sm:$0xf]  ;;  %v1914_v22 = vunpack.c.l.b16 %v1913_v18  ;;  %v1915_v23 = vunpack.c.h.b16 %v1913_v18  ;;  %v1922_v24 = vunpack.c.l.b16 %v1929_v19  ;;  %v1930_v26 = vld [vmem:[%s337_s29 + $0x18] sm:$0xff]   ;;  %s2094_s9 = smov 96  }
  0x41   : > { %v1923_v25 = vunpack.c.h.b16 %v1929_v19  ;;  %v387_v27 = vld [vmem:[%s2221_s24 + $0x10] sm:$0xf]  ;;  %v388_v28 = vld [vmem:[%s2221_s24 + $0x14] sm:$0xf]  ;;  %v1926_v29 = vunpack.c.l.b16 %v1930_v26  ;;  %v1927_v30 = vunpack.c.h.b16 %v1930_v26  ;;  %v1928_v31 = vld [vmem:[%s337_s29 + $0x8] sm:$0xff]   ;;  %s2095_s10 = smov 48  }
  0x42   : > { %v2227_v32 = vunpack.c.0.s8 %v460_v17  ;;  %v2088_v33 = vmov 1934713408   ;;  %v415_v35 = vpack.c.b16 %v1914_v22, %v1914_v22  ;;  %v416_v36 = vpack.c.b16 %v1915_v23, %v1915_v23  ;;  %v389_v39 = vld [vmem:[%s2221_s24 + $0x18] sm:$0xf]  ;;  %v390_v40 = vld [vmem:[%s2221_s24 + $0x1c] sm:$0xf] }
  0x43   : > { %v474_v34 = vunpack.c.l.s4 %v2088_v33  ;;  %v419_v37 = vpack.c.b16 %v1922_v24, %v1922_v24  ;;  %v420_v38 = vpack.c.b16 %v1923_v25, %v1923_v25  ;;  %v421_v41 = vpack.c.b16 %v1926_v29, %v1926_v29  ;;  %v385_v49 = vld [vmem:[%s2221_s24 + $0x8] sm:$0xf]  ;;  %v386_v50 = vld [vmem:[%s2221_s24 + $0xc] sm:$0xf]  ;;  %s2096_s11 = smov 112   ;;  %s2097_s21 = smov 126  }
  0x44   : > { %v422_v42 = vpack.c.b16 %v1927_v30, %v1927_v30  ;;  %v1918_v43 = vunpack.c.l.b16 %v1928_v31  ;;  %v1919_v44 = vunpack.c.h.b16 %v1928_v31  ;;  %v2232_v45 = vsel %vm423_vm0, %v383_v20, %v415_v35  ;;  %p370_p13 = scmp.lt.s32.totalorder %s2073_s17, 1  ;;  %p376_p0 = scmp.lt.s32.totalorder %s2069_s16, 1 }
  0x45   : > { %v2235_v46 = vsel %vm423_vm0, %v384_v21, %v416_v36  ;;  %v2238_v47 = vsel %vm423_vm0, %v387_v27, %v419_v37  ;;  %v2241_v48 = vsel %vm423_vm0, %v388_v28, %v420_v38  ;;  %583 = vrot.lane.b32.xlu1 %v2232_v45, %s2089_s12  ;;  %v2248_v53 = vsel %vm423_vm0, %v389_v39, %v421_v41 }
  0x46   : > { %v417_v51 = vpack.c.b16 %v1918_v43, %v1918_v43  ;;  %v418_v52 = vpack.c.b16 %v1919_v44, %v1919_v44  ;;  %v2251_v54 = vsel %vm423_vm0, %v390_v40, %v422_v42  ;;  %v456_v55 = vrot.slane %v2238_v47, 4  ;;  %585 = vrot.lane.b32.xlu2 %v2235_v46, %s2089_s12  ;;  %s3047_s17 = smov (!%p370_p13, %s2073_s17), 1  ;;  %s3049_s16 = smov (!%p376_p0, %s2069_s16), 1 }
  0x47   : > { %v463_v56 = vrot.slane %v2248_v53, 4  ;;  %v485_v57 = vrot.slane %v2241_v48, 4  ;;  %v491_v58 = vrot.slane %v2251_v54, 4  ;;  %v2279_v5 = vunpack.c.0.s8 %v474_v34  ;;  %s1886_s25 = sshll.u32 %s3047_s17, 2  ;;  %s1887_s28 = sshll.u32 %s3047_s17, 1 }
  0x48   : > { %v2260_v59 = vsel %vm423_vm0, %v385_v49, %v417_v51  ;;  %v2263_v60 = vsel %vm423_vm0, %v386_v50, %v418_v52  ;;  %v458_v61 = vsel %vm457_vm1, %v456_v55, %v2232_v45  ;;  %v1296_v40 = vrot.slane %v2248_v53, 1  ;;  %s373_s27 = scalar_lea.vmem %s3030_s2, %s1886_s25  ;;  %s379_s29 = sadd.s32 %s1887_s28, %s3049_s16 }
  0x49   : > { %587 = vrot.lane.b32.xlu0 %v2260_v59, %s2089_s12  ;;  %v464_v62 = vsel %vm457_vm1, %v463_v56, %v2260_v59  ;;  %v486_v63 = vsel %vm457_vm1, %v485_v57, %v2235_v46  ;;  %v492_v0 = vsel %vm457_vm1, %v491_v58, %v2263_v60  ;;  %v462_v1 = vperm.slane %v458_v61, %v2227_v32  ;;  %s1888_s24 = sshll.u32 %s379_s29, 2 }
  0x4a   : > { %v468_v2 = vperm.slane %v464_v62, %v2227_v32  ;;  %v490_v3 = vperm.slane %v486_v63, %v2227_v32  ;;  %v496_v4 = vperm.slane %v492_v0, %v2227_v32  ;;  %v1312_v42 = vrot.slane %v1296_v40, 4 }
  0x4b   : > { %v471_v6 = vrot.slane %v462_v1, 4  ;;  %v1292_v43 = vrot.slane %v2260_v59, 1  ;;  %v1297_v49 = vrot.slane %v2251_v54, 1  ;;  %v1293_v52 = vrot.slane %v2263_v60, 1 }
  0x4c   : > { %v499_v7 = vrot.slane %v490_v3, 4  ;;  %v469_v8 = vrot.slane %v468_v2, 4  ;;  %v497_v9 = vrot.slane %v496_v4, 4  ;;  %v1295_v55 = vrot.slane %v2241_v48, 1 }
  0x4d   : > { %v472_v10 = vsel %vm457_vm1, %v468_v2, %v471_v6  ;;  %v2314_v50 = vsel %vm457_vm1, %v1312_v42, %v1292_v43  ;;  %v1340_v51 = vrot.slane %v1297_v49, 4  ;;  %v1291_v56 = vrot.slane %v2235_v46, 1 }
  0x4e   : > { %v500_v11 = vsel %vm457_vm1, %v496_v4, %v499_v7  ;;  %v470_v12 = vsel %vm457_vm1, %v469_v8, %v462_v1  ;;  %v498_v13 = vsel %vm457_vm1, %v497_v9, %v490_v3  ;;  %v480_v14 = vperm.slane %v472_v10, %v2279_v5  ;;  %591 = vrot.lane.b32.xlu2 %v2238_v47, %s2089_s12 }
  0x4f   : > { %v508_v15 = vperm.slane %v500_v11, %v2279_v5  ;;  %v2288_v16 = vperm.slane %v470_v12, %v2279_v5  ;;  %v2291_v17 = vperm.slane %v498_v13, %v2279_v5  ;;  %v2324_v57 = vsel %vm457_vm1, %v1340_v51, %v1293_v52 }
  0x50   : > { %v528_v23 = vshrl.u32 %v480_v14, 16  ;;  %v483_v29 = vrot.slane %v480_v14, 4  ;;  %v1334_v58 = vrot.slane %v1295_v55, 4  ;;  %v1294_v61 = vrot.slane %v2238_v47, 1 }
  0x51   : > { %v527_v18 = vpack.i.b16 %v508_v15, %v480_v14  ;;  %v516_v19 = vshrl.u32 %v2288_v16, 16  ;;  %v517_v20 = vshrl.u32 %v2291_v17, 16  ;;  %v481_v21 = vrot.slane %v2288_v16, 4 }
  0x52   : > { %v509_v22 = vrot.slane %v2291_v17, 4  ;;  %v529_v24 = vshrl.u32 %v508_v15, 16  ;;  %v511_v30 = vrot.slane %v508_v15, 4  ;;  %v484_v33 = vsel %vm457_vm1, 0, %v483_v29 }
  0x53   : > { %543 = vrot.lane.b32.xlu1 %v527_v18, %s2090_s14  ;;  %v518_v25 = vpack.i.b16 %v517_v20, %v516_v19  ;;  %v482_v27 = vsel %vm457_vm1, 0, %v481_v21  ;;  %v534_v38 = vshrl.u32 %v484_v33, 16  ;;  %v2328_v62 = vsel %vm457_vm1, %v1334_v58, %v1291_v56 }
  0x54   : > { %v530_v26 = vpack.i.b16 %v529_v24, %v528_v23  ;;  %v510_v28 = vsel %vm457_vm1, 0, %v509_v22  ;;  %v512_v34 = vsel %vm457_vm1, 0, %v511_v30  ;;  %v522_v35 = vshrl.u32 %v482_v27, 16 }
  0x55   : > { %537 = vrot.lane.b32.xlu0 %v518_v25, %s2091_s30  ;;  %v521_v31 = vpack.i.b16 %v510_v28, %v482_v27  ;;  %v523_v36 = vshrl.u32 %v510_v28, 16  ;;  %v533_v37 = vpack.i.b16 %v512_v34, %v484_v33  ;;  %v535_v39 = vshrl.u32 %v512_v34, 16 }
  0x56   : > { %545 = vrot.lane.b32.xlu2 %v530_v26, %s2092_s4  ;;  %v1306_v63 = vrot.slane %v1294_v61, 4  ;;  %v1290_v0 = vrot.slane %v2232_v45, 1  ;;  %v897_v2 = vshll.u32 %v2251_v54, 16  ;;  %v895_v3 = vshrl.u32 %v2251_v54, 16 }
  0x57   : > { %v524_v41 = vpack.i.b16 %v523_v36, %v522_v35  ;;  %v536_v44 = vpack.i.b16 %v535_v39, %v534_v38  ;;  %v891_v6 = vshll.u32 %v2248_v53, 16  ;;  %v889_v8 = vshrl.u32 %v2248_v53, 16 }
  0x58   : > { %v2337_v1 = vsel %vm457_vm1, %v1306_v63, %v1290_v0  ;;  %v899_v4 = vrot.slane %v897_v2, 1  ;;  %v873_v10 = vshll.u32 %v2263_v60, 16  ;;  %v871_v13 = vshrl.u32 %v2263_v60, 16 }
  0x59   : > { %v893_v9 = vrot.slane %v891_v6, 1  ;;  %v867_v15 = vshll.u32 %v2260_v59, 16  ;;  %v865_v20 = vshrl.u32 %v2260_v59, 16  ;;  %v879_v26 = vshll.u32 %v2238_v47, 16 }
  0x5a   : > { %v900_v7 = vor.u32 %v899_v4, %v895_v3  ;;  %v875_v14 = vrot.slane %v873_v10, 1  ;;  %v877_v27 = vshrl.u32 %v2238_v47, 16  ;;  %v883_v33 = vshrl.u32 %v2241_v48, 16 }
  0x5b   : > { %589 = vrot.lane.b32.xlu1 %v2263_v60, %s2089_s12  ;;  %v894_v11 = vor.u32 %v893_v9, %v889_v8  ;;  %v869_v21 = vrot.slane %v867_v15, 1  ;;  %v881_v28 = vrot.slane %v879_v26, 1  ;;  %v853_v38 = vshrl.u32 %v2232_v45, 16 }
  0x5c   : > { %v943_v12 = vrot.slane %v900_v7, 4  ;;  %v876_v19 = vor.u32 %v875_v14, %v871_v13  ;;  %vm551_vm2 = vcmask 130048   ;;  %vm555_vm3 = vcmask 261120  }
  0x5d   : > { %539 = vrot.lane.b32.xlu0 %v521_v31, %s2093_s5  ;;  %v915_v18 = vrot.slane %v894_v11, 4  ;;  %v870_v23 = vor.u32 %v869_v21, %v865_v20  ;;  %v2379_v30 = vor.u32 %v881_v28, %v877_v27  ;;  %v885_v31 = vshll.u32 %v2241_v48, 16 }
  0x5e   : > { %547 = vrot.lane.b32.xlu2 %v533_v37, %s2094_s9  ;;  %v2366_v22 = vsel %vm457_vm1, %v943_v12, %v876_v19  ;;  %v855_v37 = vshll.u32 %v2232_v45, 16  ;;  %vm558_vm4 = vcmask 392192   ;;  %vm561_vm5 = vcmask 523264  }
  0x5f   : > { %v2370_v24 = vsel %vm457_vm1, %v915_v18, %v870_v23  ;;  %v887_v34 = vrot.slane %v885_v31, 1  ;;  %vm564_vm6 = vcmask 654336   ;;  %vm567_vm7 = vcmask 785408  }
  0x60   : > { %v857_v39 = vrot.slane %v855_v37, 1  ;;  %vm570_vm8 = vcmask 916480   ;;  %v861_v8 = vshll.u32 %v2235_v46, 16  ;;  %v859_v13 = vshrl.u32 %v2235_v46, 16 }
  0x61   : > { %v888_v35 = vor.u32 %v887_v34, %v883_v33  ;;  %vm1724_vm9 = vcmask 588800  }
  0x62   : > { %v863_v14 = vrot.slane %v861_v8, 1 }
  0x63   : > { %541 = vrot.lane.b32.xlu1 %v524_v41, %s2095_s10  ;;  %v2392_v41 = vor.u32 %v857_v39, %v853_v38 }
  0x64   : > { %v2419_v20 = vor.u32 %v863_v14, %v859_v13 }
  0x65   : > { %549 = vrot.lane.b32.xlu0 %v536_v44, %s2096_s11 }
  0x66   : > { %597 = vrot.lane.b32.xlu2 %v2251_v54, %s2089_s12 }
  0x6b   : > { %595 = vrot.lane.b32.xlu1 %v2248_v53, %s2089_s12 }
  0x6d   : > { %593 = vrot.lane.b32.xlu0 %v2241_v48, %s2089_s12 }
  0x6e   : > { %1564 = vrot.lane.b32.xlu2 %v1296_v40, %s2097_s21 }
  0x73   : > { %718 = vrot.lane.b32.xlu1 %v2232_v45, %s2097_s21 }
  0x75   : > { %1566 = vrot.lane.b32.xlu0 %v1297_v49, %s2097_s21 }
  0x76   : > { %1558 = vrot.lane.b32.xlu2 %v1293_v52, %s2097_s21 }
  0x7b   : > { %1556 = vrot.lane.b32.xlu1 %v1292_v43, %s2097_s21 }
  0x7d   : > { %1560 = vrot.lane.b32.xlu0 %v1294_v61, %s2097_s21 }
  0x7e   : > { %1552 = vrot.lane.b32.xlu2 %v1290_v0, %s2097_s21 }
  0x83   : > { %1562 = vrot.lane.b32.xlu1 %v1295_v55, %s2097_s21 }
  0x85   : > { %1554 = vrot.lane.b32.xlu0 %v1291_v56, %s2097_s21 }
  0x86   : > { %1431 = vrot.lane.b32.xlu2 %v1297_v49, %s2089_s12 }
  0x8b   : > { %1429 = vrot.lane.b32.xlu1 %v1296_v40, %s2089_s12 }
  0x8d   : > { %1421 = vrot.lane.b32.xlu0 %v1292_v43, %s2089_s12 }
  0x8e   : > { %1425 = vrot.lane.b32.xlu2 %v1294_v61, %s2089_s12 }
  0x93   : > { %1423 = vrot.lane.b32.xlu1 %v1293_v52, %s2089_s12 }
  0x95   : > { %1427 = vrot.lane.b32.xlu0 %v1295_v55, %s2089_s12 }
  0x96   : > { %1034 = vrot.lane.b32.xlu2 %v900_v7, %s2089_s12 }
  0x9b   : > { %1032 = vrot.lane.b32.xlu1 %v894_v11, %s2089_s12 }
  0x9d   : > { %1167 = vrot.lane.b32.xlu0 %v894_v11, %s2097_s21  ;;  %v937_v11 = vrot.slane %v888_v35, 4 }
  0x9e   : > { %1417 = vrot.lane.b32.xlu2 %v1290_v0, %s2089_s12 }
  0x9f   : > { %v2425_v28 = vsel %vm457_vm1, %v937_v11, %v2419_v20 }
  0xa0   : > { %v2372_v25 = vpop.permute.xlu2 %585 }
  0xa3   : > { %1169 = vrot.lane.b32.xlu1 %v900_v7, %s2097_s21 }
  0xa5   : > { %1419 = vrot.lane.b32.xlu0 %v1291_v56, %s2089_s12  ;;  %v515_v56 = vpack.i.b16 %v2291_v17, %v2288_v16 }
  0xa6   : > { %1026 = vrot.lane.b32.xlu2 %v876_v19, %s2089_s12 }
  0xa8   : > { %v592_v29 = vpop.permute.xlu2 %591 }
  0xab   : > { %1024 = vrot.lane.b32.xlu1 %v870_v23, %s2089_s12 }
  0xad   : > { %1028 = vrot.lane.b32.xlu0 %v2379_v30, %s2089_s12 }
  0xae   : > { %1159 = vrot.lane.b32.xlu2 %v870_v23, %s2097_s21 }
  0xb0   : > { %v546_v36 = vpop.permute.xlu2 %545 }
  0xb3   : > { %1030 = vrot.lane.b32.xlu1 %v888_v35, %s2089_s12 }
  0xb5   : > { %1161 = vrot.lane.b32.xlu0 %v876_v19, %s2097_s21 }
  0xb6   : > { %1165 = vrot.lane.b32.xlu2 %v888_v35, %s2097_s21 }
  0xb7   : > { %v584_v40 = vpop.permute.xlu1 %583 }
  0xb8   : > { %v548_v43 = vpop.permute.xlu2 %547 }
  0xbb   : > { %1163 = vrot.lane.b32.xlu1 %v2379_v30, %s2097_s21  ;;  %v588_v42 = vpop.permute.xlu0 %587 }
  0xbd   : > { %730 = vrot.lane.b32.xlu0 %v2248_v53, %s2097_s21 }
  0xbe   : > { %1020 = vrot.lane.b32.xlu2 %v2392_v41, %s2089_s12 }
  0xc0   : > { %v598_v49 = vpop.permute.xlu2 %597 }
  0xc1   : > { %v641_v3 = vrot.slane %v598_v49, 4 }
  0xc3   : > { %732 = vrot.lane.b32.xlu1 %v2251_v54, %s2097_s21  ;;  %v607_v54 = vrot.slane %v592_v29, 4 }
  0xc5   : > { %v544_v44 = vpop.permute.xlu1 %543  ;;  %v608_v6 = vsel %vm457_vm1, %v607_v54, %v584_v40 }
  0xc6   : > { %v612_v10 = vperm.slane %v608_v6, %v2227_v32 }
  0xc7   : > { %v538_v45 = vpop.permute.xlu0 %537 }
  0xc8   : > { %v2402_v55 = vpop.permute.xlu2 %1564  ;;  %v554_v53 = vsel %vm551_vm2, %v515_v56, %v538_v45  ;;  %v621_v26 = vrot.slane %v612_v10, 4 }
  0xcd   : > { %v590_v51 = vpop.permute.xlu1 %589 }
  0xce   : > { %v642_v9 = vsel %vm457_vm1, %v641_v3, %v590_v51 }
  0xcf   : > { %v540_v52 = vpop.permute.xlu0 %539  ;;  %v646_v18 = vperm.slane %v642_v9, %v2227_v32 }
  0xd0   : > { %v557_v58 = vsel %vm555_vm3, %v554_v53, %v540_v52  ;;  %v1559_v4 = vpop.permute.xlu2 %1558 }
  0xd1   : > { %v647_v31 = vrot.slane %v646_v18, 4 }
  0xd5   : > { %v542_v61 = vpop.permute.xlu1 %541 }
  0xd6   : > { %v560_v63 = vsel %vm558_vm4, %v557_v58, %v542_v61 }
  0xd7   : > { %v563_v0 = vsel %vm561_vm5, %v560_v63, %v544_v44  ;;  %v550_v2 = vpop.permute.xlu0 %549  ;;  %v1582_v63 = vrot.slane %v2402_v55, 4 }
  0xd8   : > { %v566_v16 = vsel %vm564_vm6, %v563_v0, %v546_v36  ;;  %v1553_v36 = vpop.permute.xlu2 %1552 }
  0xd9   : > { %v569_v17 = vsel %vm567_vm7, %v566_v16, %v548_v43 }
  0xda   : > { %v572_v7 = vsel %vm570_vm8, %v569_v17, %v550_v2 }
  0xdb   : > { %574 = vst [vmem:[#allocation2] sm:$0xf] %v572_v7 }
  0xdd   : > { %v596_v12 = vpop.permute.xlu1 %595 }
  0xde   : > { %v613_v15 = vrot.slane %v596_v12, 4 }
  0xdf   : > { %v594_v19 = vpop.permute.xlu0 %593 }
  0xe0   : > { %v614_v21 = vsel %vm457_vm1, %v613_v15, %v588_v42  ;;  %v635_v23 = vrot.slane %v594_v19, 4  ;;  %v2451_v7 = vpop.permute.xlu2 %1431 }
  0xe1   : > { %v618_v27 = vperm.slane %v614_v21, %v2227_v32 }
  0xe2   : > { %v636_v29 = vsel %vm457_vm1, %v635_v23, %v2372_v25 }
  0xe3   : > { %v619_v33 = vrot.slane %v618_v27, 4  ;;  %v640_v34 = vperm.slane %v636_v29, %v2227_v32  ;;  %v622_v35 = vsel %vm457_vm1, %v618_v27, %v621_v26 }
  0xe4   : > { %v630_v37 = vperm.slane %v622_v35, %v2279_v5 }
  0xe5   : > { %v648_v38 = vsel %vm457_vm1, %v647_v31, %v640_v34  ;;  %v649_v39 = vrot.slane %v640_v34, 4  ;;  %v2433_v40 = vpop.permute.xlu1 %718  ;;  %v620_v42 = vsel %vm457_vm1, %v619_v33, %v612_v10 }
  0xe6   : > { %v2437_v43 = vperm.slane %v620_v42, %v2279_v5  ;;  %v2440_v25 = vperm.slane %v648_v38, %v2279_v5  ;;  %v633_v51 = vrot.slane %v630_v37, 4  ;;  %v678_v52 = vshrl.u32 %v630_v37, 16 }
  0xe7   : > { %v1567_v44 = vpop.permute.xlu0 %1566  ;;  %v650_v45 = vsel %vm457_vm1, %v646_v18, %v649_v39 }
  0xe8   : > { %v658_v49 = vperm.slane %v650_v45, %v2279_v5  ;;  %v631_v56 = vrot.slane %v2437_v43, 4  ;;  %v659_v54 = vrot.slane %v2440_v25, 4  ;;  %v1610_v0 = vrot.slane %v1567_v44, 4  ;;  %v1426_v42 = vpop.permute.xlu2 %1425 }
  0xe9   : > { %v634_v3 = vsel %vm457_vm1, 0, %v633_v51  ;;  %v666_v6 = vshrl.u32 %v2437_v43, 16  ;;  %v667_v9 = vshrl.u32 %v2440_v25, 16  ;;  %v665_v11 = vpack.i.b16 %v2440_v25, %v2437_v43 }
  0xea   : > { %v677_v53 = vpack.i.b16 %v658_v49, %v630_v37  ;;  %v679_v58 = vshrl.u32 %v658_v49, 16  ;;  %v661_v61 = vrot.slane %v658_v49, 4  ;;  %v632_v55 = vsel %vm457_vm1, 0, %v631_v56 }
  0xeb   : > { %v660_v10 = vsel %vm457_vm1, 0, %v659_v54  ;;  %v1611_v14 = vsel %vm457_vm1, %v1610_v0, %v1559_v4  ;;  %v672_v18 = vshrl.u32 %v632_v55, 16  ;;  %v668_v21 = vpack.i.b16 %v667_v9, %v666_v6 }
  0xec   : > { %693 = vrot.lane.b32.xlu0 %v677_v53, %s2090_s14  ;;  %v680_v2 = vpack.i.b16 %v679_v58, %v678_v52  ;;  %v662_v16 = vsel %vm457_vm1, 0, %v661_v61  ;;  %v673_v19 = vshrl.u32 %v660_v10, 16  ;;  %v1615_v26 = vperm.slane %v1611_v14, %v2227_v32 }
  0xed   : > { %v683_v17 = vpack.i.b16 %v662_v16, %v634_v3  ;;  %v1557_v8 = vpop.permute.xlu1 %1556  ;;  %v671_v29 = vpack.i.b16 %v660_v10, %v632_v55  ;;  %v685_v35 = vshrl.u32 %v662_v16, 16  ;;  %v684_v44 = vshrl.u32 %v634_v3, 16 }
  0xee   : > { %695 = vrot.lane.b32.xlu1 %v680_v2, %s2092_s4  ;;  %v1583_v13 = vsel %vm457_vm1, %v1582_v63, %v1557_v8  ;;  %v674_v31 = vpack.i.b16 %v673_v19, %v672_v18  ;;  %v1616_v38 = vrot.slane %v1615_v26, 4  ;;  %v2475_v56 = vperm.slane %v2314_v50, %v2227_v32 }
  0xef   : > { %697 = vrot.lane.b32.xlu2 %v683_v17, %s2094_s9  ;;  %v1561_v12 = vpop.permute.xlu0 %1560  ;;  %v1587_v23 = vperm.slane %v1583_v13, %v2227_v32  ;;  %v686_v51 = vpack.i.b16 %v685_v35, %v684_v44  ;;  %v2480_v53 = vperm.slane %v2324_v57, %v2227_v32  ;;  %v2497_v57 = vperm.slane %v2337_v1, %v2227_v32 }
  0xf0   : > { %v1576_v15 = vrot.slane %v1561_v12, 4  ;;  %v1318_v63 = vrot.slane %v2475_v56, 4  ;;  %v2502_v2 = vperm.slane %v2328_v62, %v2227_v32  ;;  %v2504_v3 = vpop.permute.xlu2 %1034  ;;  %v1441_v12 = vrot.slane %v1426_v42, 4 }
  0xf1   : > { %v1588_v4 = vrot.slane %v1587_v23, 4  ;;  %v1346_v0 = vrot.slane %v2480_v53, 4  ;;  %v1078_v25 = vrot.slane %v2504_v3, 4 }
  0xf2   : > { %v1577_v27 = vsel %vm457_vm1, %v1576_v15, %v1553_v36  ;;  %v1319_v17 = vsel %vm457_vm1, %v1318_v63, %v2497_v57 }
  0xf3   : > { %v1581_v34 = vperm.slane %v1577_v27, %v2227_v32  ;;  %v1347_v6 = vsel %vm457_vm1, %v1346_v0, %v2502_v2 }
  0xf4   : > { %687 = vrot.lane.b32.xlu0 %v668_v21, %s2091_s30 }
  0xf5   : > { %v1563_v33 = vpop.permute.xlu1 %1562  ;;  %v1589_v49 = vsel %vm457_vm1, %v1588_v4, %v1581_v34  ;;  %v1590_v1 = vrot.slane %v1581_v34, 4 }
  0xf6   : > { %689 = vrot.lane.b32.xlu1 %v671_v29, %s2093_s5  ;;  %v1604_v37 = vrot.slane %v1563_v33, 4  ;;  %v2483_v58 = vperm.slane %v1589_v49, %v2279_v5 }
  0xf7   : > { %691 = vrot.lane.b32.xlu2 %v674_v31, %s2095_s10  ;;  %v1555_v39 = vpop.permute.xlu0 %1554  ;;  %v1591_v14 = vsel %vm457_vm1, %v1587_v23, %v1590_v1  ;;  %v2553_v1 = vperm.slane %v1347_v6, %v2279_v5 }
  0xf8   : > { %v1605_v36 = vsel %vm457_vm1, %v1604_v37, %v1555_v39  ;;  %v1635_v8 = vshrl.u32 %v2483_v58, 16  ;;  %v1418_v18 = vpop.permute.xlu2 %1417  ;;  %v1599_v23 = vperm.slane %v1591_v14, %v2279_v5 }
  0xf9   : > { %v1609_v45 = vperm.slane %v1605_v36, %v2227_v32  ;;  %v1442_v27 = vsel %vm457_vm1, %v1441_v12, %v1418_v18 }
  0xfa   : > { %v1602_v39 = vrot.slane %v1599_v23, 4 }
  0xfb   : > { %v1617_v52 = vsel %vm457_vm1, %v1616_v38, %v1609_v45  ;;  %v1618_v62 = vrot.slane %v1609_v45, 4 }
  0xfc   : > { %699 = vrot.lane.b32.xlu0 %v686_v51, %s2096_s11  ;;  %v2486_v61 = vperm.slane %v1617_v52, %v2279_v5  ;;  %v1603_v51 = vsel %vm457_vm1, 0, %v1602_v39 }
  0xfd   : > { %v1430_v16 = vpop.permute.xlu1 %1429  ;;  %v1619_v21 = vsel %vm457_vm1, %v1615_v26, %v1618_v62 }
  0xfe   : > { %1155 = vrot.lane.b32.xlu1 %v2392_v41, %s2097_s21  ;;  %v1634_v54 = vpack.i.b16 %v2486_v61, %v2483_v58  ;;  %v1636_v55 = vshrl.u32 %v2486_v61, 16  ;;  %v1628_v10 = vrot.slane %v2486_v61, 4  ;;  %v1447_v13 = vrot.slane %v1430_v16, 4 }
  0xff   : > { %1157 = vrot.lane.b32.xlu2 %v2419_v20, %s2097_s21  ;;  %v1422_v50 = vpop.permute.xlu0 %1421  ;;  %v1627_v4 = vperm.slane %v1619_v21, %v2279_v5  ;;  %v2549_v16 = vperm.slane %v1319_v17, %v2279_v5  ;;  %v1647_v21 = vshrl.u32 %v1599_v23, 16 }
 0x100   : > { %v1637_v15 = vpack.i.b16 %v1636_v55, %v1635_v8  ;;  %v1629_v19 = vsel %vm457_vm1, 0, %v1628_v10  ;;  %v1448_v29 = vsel %vm457_vm1, %v1447_v13, %v1422_v50 }
 0x101   : > { %v1642_v34 = vshrl.u32 %v1629_v19, 16  ;;  %v1630_v42 = vrot.slane %v1627_v4, 4  ;;  %v1646_v45 = vpack.i.b16 %v1627_v4, %v1599_v23  ;;  %v1330_v13 = vrot.slane %v2549_v16, 4 }
 0x103   : > { %v1631_v52 = vsel %vm457_vm1, 0, %v1630_v42 }
 0x104   : > { %1022 = vrot.lane.b32.xlu0 %v2419_v20, %s2089_s12  ;;  %v1600_v20 = vrot.slane %v2483_v58, 4  ;;  %v1654_v55 = vshrl.u32 %v1631_v52, 16  ;;  %v1652_v6 = vpack.i.b16 %v1631_v52, %v1603_v51 }
 0x105   : > { %v1424_v31 = vpop.permute.xlu1 %1423 }
 0x106   : > { %724 = vrot.lane.b32.xlu1 %v2263_v60, %s2097_s21  ;;  %v1601_v60 = vsel %vm457_vm1, 0, %v1600_v20 }
 0x107   : > { %726 = vrot.lane.b32.xlu2 %v2238_v47, %s2097_s21  ;;  %v1428_v9 = vpop.permute.xlu0 %1427  ;;  %v1475_v47 = vrot.slane %v2451_v7, 4  ;;  %v1641_v33 = vshrl.u32 %v1601_v60, 16  ;;  %v1446_v7 = vperm.slane %v1442_v27, %v2227_v32  ;;  %v1640_v20 = vpack.i.b16 %v1629_v19, %v1601_v60 }
 0x108   : > { %v1469_v36 = vrot.slane %v1428_v9, 4  ;;  %v1653_v9 = vshrl.u32 %v1603_v51, 16 }
 0x109   : > { %v1476_v35 = vsel %vm457_vm1, %v1475_v47, %v1424_v31  ;;  %v1455_v37 = vrot.slane %v1446_v7, 4  ;;  %v1643_v38 = vpack.i.b16 %v1642_v34, %v1641_v33  ;;  %v1648_v47 = vshrl.u32 %v1627_v4, 16 }
 0x10a   : > { %v1655_v19 = vpack.i.b16 %v1654_v55, %v1653_v9  ;;  %v1331_v33 = vsel %vm457_vm1, 0, %v1330_v13  ;;  %v2604_v13 = vpop.permute.xlu2 %1026 }
 0x10c   : > { %722 = vrot.lane.b32.xlu0 %v2260_v59, %s2097_s21  ;;  %v1452_v59 = vperm.slane %v1448_v29, %v2227_v32 }
 0x10e   : > { %720 = vrot.lane.b32.xlu1 %v2235_v46, %s2097_s21  ;;  %v1453_v44 = vrot.slane %v1452_v59, 4  ;;  %v1480_v46 = vperm.slane %v1476_v35, %v2227_v32  ;;  %v1456_v49 = vsel %vm457_vm1, %v1452_v59, %v1455_v37 }
 0x10f   : > { %1656 = vrot.lane.b32.xlu2 %v1637_v15, %s2091_s30  ;;  %v2536_v26 = vpop.permute.xlu0 %1167  ;;  %v2556_v8 = vperm.slane %v1456_v49, %v2279_v5  ;;  %v1358_v15 = vrot.slane %v2553_v1, 4  ;;  %v1366_v49 = vshrl.u32 %v2553_v1, 16 }
 0x110   : > { %v1481_v50 = vrot.slane %v1480_v46, 4  ;;  %v1454_v0 = vsel %vm457_vm1, %v1453_v44, %v1446_v7 }
 0x111   : > { %v2560_v10 = vperm.slane %v1454_v0, %v2279_v5  ;;  %v1467_v18 = vrot.slane %v2556_v8, 4  ;;  %v1512_v34 = vshrl.u32 %v2556_v8, 16  ;;  %v1359_v23 = vsel %vm457_vm1, 0, %v1358_v15 }
 0x112   : > { %v1370_v44 = vpack.i.b16 %v1359_v23, %v1331_v33  ;;  %v1372_v9 = vshrl.u32 %v1359_v23, 16 }
 0x113   : > { %v1500_v27 = vshrl.u32 %v2560_v10, 16  ;;  %v1465_v59 = vrot.slane %v2560_v10, 4  ;;  %v2584_v35 = vsel %vm457_vm1, 0, %v1467_v18 }
 0x114   : > { %728 = vrot.lane.b32.xlu0 %v2241_v48, %s2097_s21 }
 0x115   : > { %v1466_v51 = vsel %vm457_vm1, 0, %v1465_v59 }
 0x116   : > { %1660 = vrot.lane.b32.xlu1 %v1643_v38, %s2095_s10  ;;  %v1649_v38 = vpack.i.b16 %v1648_v47, %v1647_v21  ;;  %v1506_v55 = vshrl.u32 %v1466_v51, 16 }
 0x117   : > { %1662 = vrot.lane.b32.xlu2 %v1646_v45, %s2090_s14  ;;  %v1420_v63 = vpop.permute.xlu0 %1419  ;;  %v1518_v45 = vshrl.u32 %v2584_v35, 16 }
 0x118   : > { %v1470_v48 = vsel %vm457_vm1, %v1469_v36, %v1420_v63 }
 0x119   : > { %v1474_v62 = vperm.slane %v1470_v48, %v2227_v32  ;;  %v1033_v48 = vpop.permute.xlu1 %1032 }
 0x11b   : > { %v1482_v12 = vsel %vm457_vm1, %v1481_v50, %v1474_v62  ;;  %v1483_v17 = vrot.slane %v1474_v62, 4  ;;  %v1371_v62 = vshrl.u32 %v1331_v33, 16  ;;  %v1348_v33 = vrot.slane %v2502_v2, 4 }
 0x11c   : > { %v2565_v14 = vperm.slane %v1482_v12, %v2279_v5  ;;  %1658 = vrot.lane.b32.xlu0 %v1640_v20, %s2093_s5 }
 0x11d   : > { %v1484_v60 = vsel %vm457_vm1, %v1480_v46, %v1483_v17  ;;  %v1365_v46 = vshrl.u32 %v2549_v16, 16  ;;  %v1349_v59 = vsel %vm457_vm1, %v2480_v53, %v1348_v33 }
 0x11e   : > { %1666 = vrot.lane.b32.xlu1 %v1652_v6, %s2094_s9  ;;  %v1501_v29 = vshrl.u32 %v2565_v14, 16  ;;  %v1492_v31 = vperm.slane %v1484_v60, %v2279_v5  ;;  %v1499_v7 = vpack.i.b16 %v2565_v14, %v2560_v10  ;;  %v1493_v4 = vrot.slane %v2565_v14, 4 }
 0x11f   : > { %1668 = vrot.lane.b32.xlu2 %v1655_v19, %s2096_s11  ;;  %v1367_v17 = vpack.i.b16 %v1366_v49, %v1365_v46  ;;  %v1373_v6 = vpack.i.b16 %v1372_v9, %v1371_v62  ;;  %v1160_v19 = vpop.permute.xlu2 %1159 }
 0x120   : > { %v1513_v37 = vshrl.u32 %v1492_v31, 16  ;;  %v1502_v39 = vpack.i.b16 %v1501_v29, %v1500_v27  ;;  %v1495_v42 = vrot.slane %v1492_v31, 4  ;;  %v1494_v52 = vsel %vm457_vm1, 0, %v1493_v4 }
 0x121   : > { %v1507_v20 = vshrl.u32 %v1494_v52, 16  ;;  %v1170_v18 = vpop.permute.xlu1 %1169  ;;  %v1505_v60 = vpack.i.b16 %v1494_v52, %v1466_v51  ;;  %v1511_v21 = vpack.i.b16 %v1492_v31, %v2556_v8  ;;  %v1320_v27 = vrot.slane %v2497_v57, 4  ;;  %v1029_v31 = vpop.permute.xlu0 %1028 }
 0x122   : > { %v2587_v36 = vpack.i.b16 %v1513_v37, %v1512_v34  ;;  %v2595_v50 = vsel %vm457_vm1, 0, %v1495_v42  ;;  %v1357_v8 = vperm.slane %v1349_v59, %v2279_v5  ;;  %v1050_v51 = vrot.slane %v1033_v48, 4 }
 0x123   : > { %v1517_v63 = vpack.i.b16 %v2595_v50, %v2584_v35  ;;  %v1519_v0 = vshrl.u32 %v2595_v50, 16  ;;  %v1508_v15 = vpack.i.b16 %v1507_v20, %v1506_v55  ;;  %v1321_v23 = vsel %vm457_vm1, %v2475_v56, %v1320_v27 }
 0x124   : > { %1664 = vrot.lane.b32.xlu0 %v1649_v38, %s2092_s4  ;;  %v1329_v4 = vperm.slane %v1321_v23, %v2279_v5 }
 0x125   : > { %v2602_v12 = vpack.i.b16 %v1519_v0, %v1518_v45  ;;  %v1213_v0 = vrot.slane %v1170_v18, 4 }
 0x126   : > { %1521 = vrot.lane.b32.xlu1 %v1502_v39, %s2091_s30  ;;  %v1376_v37 = vpack.i.b16 %v1357_v8, %v1329_v4  ;;  %v1377_v38 = vshrl.u32 %v1329_v4, 16  ;;  %v1378_v39 = vshrl.u32 %v1357_v8, 16 }
 0x127   : > { %1388 = vrot.lane.b32.xlu2 %v1370_v44, %s2093_s5  ;;  %v1166_v29 = vpop.permute.xlu2 %1165 }
 0x128   : > { %v1379_v2 = vpack.i.b16 %v1378_v39, %v1377_v38  ;;  %v1207_v55 = vrot.slane %v1166_v29, 4 }
 0x129   : > { %v1025_v47 = vpop.permute.xlu1 %1024  ;;  %v1162_v42 = vpop.permute.xlu0 %1161 }
 0x12a   : > { %v1051_v62 = vsel %vm457_vm1, %v1050_v51, %v1025_v47  ;;  %v1214_v20 = vsel %vm457_vm1, %v1213_v0, %v1162_v42  ;;  %v1332_v51 = vrot.slane %v1329_v4, 4 }
 0x12b   : > { %v2638_v18 = vperm.slane %v1214_v20, %v2227_v32 }
 0x12c   : > { %1386 = vrot.lane.b32.xlu0 %v1367_v17, %s2091_s30  ;;  %v1185_v17 = vrot.slane %v2536_v26, 4 }
 0x12e   : > { %1390 = vrot.lane.b32.xlu1 %v1373_v6, %s2095_s10  ;;  %v1044_v6 = vrot.slane %v1029_v31, 4  ;;  %v1186_v29 = vsel %vm457_vm1, %v1185_v17, %v1160_v19 }
 0x12f   : > { %1525 = vrot.lane.b32.xlu2 %v1508_v15, %s2095_s10  ;;  %v1021_v57 = vpop.permute.xlu2 %1020 }
 0x130   : > { %v1045_v26 = vsel %vm457_vm1, %v1044_v6, %v1021_v57 }
 0x131   : > { %v2614_v34 = vpop.permute.xlu1 %1030  ;;  %v2624_v46 = vpop.permute.xlu0 %730  ;;  %v1049_v19 = vperm.slane %v1045_v26, %v2227_v32 }
 0x134   : > { %1523 = vrot.lane.b32.xlu0 %v1505_v60, %s2093_s5  ;;  %v1055_v60 = vperm.slane %v1051_v62, %v2227_v32  ;;  %v1058_v62 = vrot.slane %v1049_v19, 4 }
 0x136   : > { %1527 = vrot.lane.b32.xlu1 %v1511_v21, %s2090_s14  ;;  %v1056_v59 = vrot.slane %v1055_v60, 4 }
 0x139   : > { %v1164_v44 = vpop.permute.xlu1 %1163 }
 0x13a   : > { %v1179_v42 = vrot.slane %v1164_v44, 4 }
 0x13c   : > { %1392 = vrot.lane.b32.xlu0 %v1376_v37, %s2090_s14  ;;  %v2652_v37 = vperm.slane %v1186_v29, %v2227_v32  ;;  %v1059_v29 = vsel %vm457_vm1, %v1055_v60, %v1058_v62 }
 0x13e   : > { %1394 = vrot.lane.b32.xlu1 %v1379_v2, %s2092_s4  ;;  %v1057_v2 = vsel %vm457_vm1, %v1056_v59, %v1049_v19  ;;  %v1191_v0 = vrot.slane %v2652_v37, 4 }
 0x141   : > { %v2626_v53 = vpop.permute.xlu1 %732 }
 0x149   : > { %v698_v56 = vpop.permute.xlu2 %697 }
 0x151   : > { %v692_v45 = vpop.permute.xlu2 %691 }
 0x159   : > { %v1158_v9 = vpop.permute.xlu2 %1157 }
 0x15a   : > { %v1208_v21 = vsel %vm457_vm1, %v1207_v55, %v1158_v9  ;;  %v2668_v55 = vperm.slane %v1057_v2, %v2279_v5 }
 0x15b   : > { %v2644_v33 = vperm.slane %v1208_v21, %v2227_v32  ;;  %v1072_v21 = vrot.slane %v2614_v34, 4 }
 0x15e   : > { %v694_v49 = vpop.permute.xlu0 %693 }
 0x160   : > { %v696_v52 = vpop.permute.xlu1 %695 }
 0x166   : > { %v688_v15 = vpop.permute.xlu0 %687 }
 0x167   : > { %v703_v48 = vsel %vm551_vm2, %v665_v11, %v688_v15  ;;  %v1219_v11 = vrot.slane %v2638_v18, 4 }
 0x168   : > { %v690_v47 = vpop.permute.xlu1 %689 }
 0x169   : > { %v705_v27 = vsel %vm555_vm3, %v703_v48, %v690_v47  ;;  %v1220_v39 = vsel %vm457_vm1, %v1219_v11, %v2644_v33  ;;  %v2701_v11 = vperm.slane %v2366_v22, %v2227_v32  ;;  %v909_v22 = vrot.slane %v2379_v30, 4 }
 0x16a   : > { %v707_v23 = vsel %vm558_vm4, %v705_v27, %v692_v45  ;;  %v1079_v45 = vsel %vm457_vm1, %v1078_v25, %v2604_v13  ;;  %v2674_v13 = vsel %vm457_vm1, 0, %v1332_v51 }
 0x16b   : > { %v709_v43 = vsel %vm561_vm5, %v707_v23, %v694_v49  ;;  %v1383_v20 = vshrl.u32 %v2674_v13, 16  ;;  %v1083_v6 = vperm.slane %v1079_v45, %v2227_v32  ;;  %v1068_v23 = vrot.slane %v2668_v55, 4 }
 0x16c   : > { %v711_v31 = vsel %vm564_vm6, %v709_v43, %v696_v52  ;;  %v1360_v52 = vrot.slane %v1357_v8, 4  ;;  %v949_v62 = vrot.slane %v2701_v11, 4 }
 0x16d   : > { %v713_v38 = vsel %vm567_vm7, %v711_v31, %v698_v56  ;;  %v2664_v56 = vperm.slane %v1220_v39, %v2279_v5  ;;  %v1084_v31 = vrot.slane %v1083_v6, 4 }
 0x16e   : > { %v700_v57 = vpop.permute.xlu0 %699  ;;  %v2677_v4 = vsel %vm457_vm1, 0, %v1360_v52 }
 0x16f   : > { %v715_v3 = vsel %vm570_vm8, %v713_v38, %v700_v57  ;;  %v1382_v8 = vpack.i.b16 %v2677_v4, %v2674_v13  ;;  %v1384_v17 = vshrl.u32 %v2677_v4, 16  ;;  %v1231_v47 = vrot.slane %v2664_v56, 4 }
 0x170   : > { %717 = vst [vmem:[#allocation2 + $0x4] sm:$0xf] %v715_v3  ;;  %v1156_v49 = vpop.permute.xlu1 %1155  ;;  %v1239_v25 = vshrl.u32 %v2664_v56, 16  ;;  %v2707_v38 = vperm.slane %v1059_v29, %v2279_v5  ;;  %v727_v3 = vpop.permute.xlu2 %726  ;;  %v910_v29 = vsel %vm457_vm1, %v909_v22, %v2392_v41 }
 0x171   : > { %v1180_v9 = vsel %vm457_vm1, %v1179_v42, %v1156_v49  ;;  %v2691_v27 = vpack.i.b16 %v1384_v17, %v1383_v20  ;;  %v2713_v42 = vsel %vm457_vm1, 0, %v1231_v47  ;;  %v1103_v20 = vshrl.u32 %v2668_v55, 16 }
 0x172   : > { %v2671_v44 = vperm.slane %v1180_v9, %v2227_v32  ;;  %v2727_v9 = vperm.slane %v2370_v24, %v2227_v32  ;;  %v748_v17 = vrot.slane %v2624_v46, 4  ;;  %v1070_v47 = vrot.slane %v2707_v38, 4 }
 0x174   : > { %v1192_v15 = vsel %vm457_vm1, %v1191_v0, %v2671_v44  ;;  %v1069_v0 = vsel %vm457_vm1, 0, %v1068_v23 }
 0x175   : > { %v2688_v48 = vperm.slane %v1192_v15, %v2279_v5  ;;  %v1109_v24 = vshrl.u32 %v1069_v0, 16 }
 0x176   : > { %v1023_v26 = vpop.permute.xlu0 %1022 }
 0x177   : > { %v1073_v59 = vsel %vm457_vm1, %v1072_v21, %v1023_v26  ;;  %v1238_v43 = vshrl.u32 %v2688_v48, 16  ;;  %v1203_v34 = vrot.slane %v2688_v48, 4  ;;  %v1237_v60 = vpack.i.b16 %v2664_v56, %v2688_v48 }
 0x178   : > { %v1077_v19 = vperm.slane %v1073_v59, %v2227_v32  ;;  %v725_v39 = vpop.permute.xlu1 %724  ;;  %v742_v59 = vrot.slane %v727_v3, 4  ;;  %v2753_v3 = vsel %vm457_vm1, 0, %v1070_v47  ;;  %v1657_v47 = vpop.permute.xlu2 %1656 }
 0x179   : > { %v1240_v57 = vpack.i.b16 %v1239_v25, %v1238_v43  ;;  %v2710_v2 = vsel %vm457_vm1, 0, %v1203_v34  ;;  %v1672_v35 = vsel %vm551_vm2, %v1634_v54, %v1657_v47  ;;  %v1245_v47 = vshrl.u32 %v2713_v42, 16 }
 0x17a   : > { %v1085_v45 = vsel %vm457_vm1, %v1084_v31, %v1077_v19  ;;  %v1086_v49 = vrot.slane %v1077_v19, 4  ;;  %v1243_v51 = vpack.i.b16 %v2713_v42, %v2710_v2 }
 0x17b   : > { %v2720_v52 = vperm.slane %v1085_v45, %v2279_v5  ;;  %1259 = vrot.lane.b32.xlu0 %v1240_v57, %s2091_s30  ;;  %v776_v57 = vrot.slane %v2626_v53, 4  ;;  %v743_v53 = vsel %vm457_vm1, %v742_v59, %v2433_v40  ;;  %v1121_v40 = vshrl.u32 %v2753_v3, 16 }
 0x17c   : > { %v1087_v30 = vsel %vm457_vm1, %v1083_v6, %v1086_v49  ;;  %1261 = vrot.lane.b32.xlu1 %v1243_v51, %s2093_s5  ;;  %v1115_v6 = vshrl.u32 %v2707_v38, 16  ;;  %v921_v49 = vrot.slane %v2727_v9, 4  ;;  %v2758_v51 = vperm.slane %v910_v29, %v2227_v32 }
 0x17d   : > { %v1104_v15 = vshrl.u32 %v2720_v52, 16  ;;  %v1096_v21 = vrot.slane %v2720_v52, 4  ;;  %v2739_v23 = vperm.slane %v1087_v30, %v2279_v5 }
 0x17e   : > { %v723_v26 = vpop.permute.xlu0 %722 }
 0x17f   : > { %v749_v43 = vsel %vm457_vm1, %v748_v17, %v723_v26  ;;  %v1105_v46 = vpack.i.b16 %v1104_v15, %v1103_v20  ;;  %v1097_v25 = vsel %vm457_vm1, 0, %v1096_v21  ;;  %v1114_v41 = vpack.i.b16 %v2739_v23, %v2707_v38 }
 0x180   : > { %v2745_v34 = vperm.slane %v749_v43, %v2227_v32  ;;  %v1108_v31 = vpack.i.b16 %v1097_v25, %v1069_v0  ;;  %v1110_v19 = vshrl.u32 %v1097_v25, 16  ;;  %v1116_v22 = vshrl.u32 %v2739_v23, 16  ;;  %v721_v17 = vpop.permute.xlu1 %720 }
 0x181   : > { %1124 = vrot.lane.b32.xlu2 %v1105_v46, %s2091_s30  ;;  %v1098_v45 = vrot.slane %v2739_v23, 4  ;;  %v2762_v0 = vperm.slane %v2425_v28, %v2227_v32  ;;  %v777_v20 = vsel %vm457_vm1, %v776_v57, %v725_v39  ;;  %v2780_v26 = vperm.slane %v743_v53, %v2227_v32 }
 0x182   : > { %v1111_v30 = vpack.i.b16 %v1110_v19, %v1109_v24  ;;  %v2768_v15 = vpack.i.b16 %v1116_v22, %v1115_v6  ;;  %v754_v29 = vrot.slane %v2745_v34, 4  ;;  %v2783_v24 = vperm.slane %v777_v20, %v2227_v32 }
 0x183   : > { %1126 = vrot.lane.b32.xlu0 %v1108_v31, %s2093_s5  ;;  %v2771_v21 = vsel %vm457_vm1, 0, %v1098_v45  ;;  %v922_v25 = vsel %vm457_vm1, %v921_v49, %v2758_v51  ;;  %v950_v31 = vsel %vm457_vm1, %v949_v62, %v2762_v0  ;;  %v1193_v45 = vrot.slane %v2671_v44, 4  ;;  %v1663_v44 = vpop.permute.xlu2 %1662 }
 0x184   : > { %1128 = vrot.lane.b32.xlu1 %v1111_v30, %s2095_s10  ;;  %v1120_v28 = vpack.i.b16 %v2771_v21, %v2753_v3  ;;  %v1122_v39 = vshrl.u32 %v2771_v21, 16  ;;  %v755_v46 = vsel %vm457_vm1, %v754_v29, %v2780_v26  ;;  %v782_v57 = vrot.slane %v2783_v24, 4 }
 0x185   : > { %v2802_v30 = vperm.slane %v755_v46, %v2279_v5  ;;  %v1194_v50 = vsel %vm457_vm1, %v2652_v37, %v1193_v45  ;;  %v1244_v37 = vshrl.u32 %v2710_v2, 16  ;;  %v923_v29 = vrot.slane %v2758_v51, 4 }
 0x186   : > { %v729_v6 = vpop.permute.xlu0 %728  ;;  %v2785_v59 = vpack.i.b16 %v1122_v39, %v1121_v40  ;;  %v2834_v61 = vperm.slane %v1194_v50, %v2279_v5  ;;  %v951_v40 = vrot.slane %v2762_v0, 4  ;;  %v2857_v51 = vperm.slane %v922_v25, %v2279_v5 }
 0x187   : > { %v770_v43 = vrot.slane %v729_v6, 4  ;;  %v1246_v2 = vpack.i.b16 %v1245_v47, %v1244_v37  ;;  %v2860_v0 = vperm.slane %v950_v31, %v2279_v5  ;;  %v924_v45 = vsel %vm457_vm1, %v2727_v9, %v923_v29 }
 0x188   : > { %v933_v31 = vrot.slane %v2857_v51, 4 }
 0x189   : > { %v771_v19 = vsel %vm457_vm1, %v770_v43, %v721_v17  ;;  %1529 = vrot.lane.b32.xlu2 %v2587_v36, %s2092_s4  ;;  %v1221_v36 = vrot.slane %v2644_v33, 4  ;;  %v969_v50 = vshrl.u32 %v2860_v0, 16 }
 0x18a   : > { %v2798_v22 = vperm.slane %v771_v19, %v2227_v32  ;;  %v1661_v32 = vpop.permute.xlu1 %1660 }
 0x18b   : > { %1531 = vrot.lane.b32.xlu0 %v1517_v63, %s2094_s9  ;;  %v801_v63 = vshrl.u32 %v2802_v30, 16  ;;  %v1222_v17 = vsel %vm457_vm1, %v2638_v18, %v1221_v36  ;;  %v1669_v6 = vpop.permute.xlu2 %1668  ;;  %v2869_v36 = vperm.slane %v924_v45, %v2279_v5 }
 0x18c   : > { %v783_v62 = vsel %vm457_vm1, %v782_v57, %v2798_v22  ;;  %1533 = vrot.lane.b32.xlu1 %v2602_v12, %s2096_s11  ;;  %v2842_v18 = vperm.slane %v1222_v17, %v2279_v5  ;;  %v784_v47 = vrot.slane %v2798_v22, 4 }
 0x18d   : > { %v2814_v49 = vperm.slane %v783_v62, %v2279_v5  ;;  %v952_v62 = vsel %vm457_vm1, %v2701_v11, %v951_v40  ;;  %v935_v3 = vrot.slane %v2869_v36, 4 }
 0x18e   : > { %v1659_v53 = vpop.permute.xlu0 %1658  ;;  %v1251_v46 = vshrl.u32 %v2842_v18, 16  ;;  %v1249_v19 = vpack.i.b16 %v2842_v18, %v2834_v61  ;;  %v2872_v25 = vperm.slane %v952_v62, %v2279_v5  ;;  %v785_v22 = vsel %vm457_vm1, %v2783_v24, %v784_v47 }
 0x18f   : > { %v802_v12 = vshrl.u32 %v2814_v49, 16  ;;  %v1674_v33 = vsel %vm555_vm3, %v1672_v35, %v1659_v53  ;;  %v800_v20 = vpack.i.b16 %v2814_v49, %v2802_v30  ;;  %v968_v35 = vshrl.u32 %v2857_v51, 16 }
 0x190   : > { %v1676_v54 = vsel %vm558_vm4, %v1674_v33, %v1661_v32  ;;  %v961_v32 = vrot.slane %v2860_v0, 4  ;;  %v981_v53 = vshrl.u32 %v2872_v25, 16  ;;  %v979_v17 = vpack.i.b16 %v2872_v25, %v2869_v36 }
 0x191   : > { %1396 = vrot.lane.b32.xlu2 %v1382_v8, %s2094_s9  ;;  %v803_v58 = vpack.i.b16 %v802_v12, %v801_v63  ;;  %v1678_v13 = vsel %vm561_vm5, %v1676_v54, %v1663_v44  ;;  %v1250_v8 = vshrl.u32 %v2834_v61, 16  ;;  %v980_v44 = vshrl.u32 %v2869_v36, 16 }
 0x192   : > { %v1667_v39 = vpop.permute.xlu1 %1666  ;;  %v934_v63 = vsel %vm457_vm1, 0, %v933_v31  ;;  %v962_v12 = vsel %vm457_vm1, 0, %v961_v32  ;;  %v794_v37 = vrot.slane %v2814_v49, 4  ;;  %v963_v21 = vrot.slane %v2872_v25, 4 }
 0x193   : > { %1398 = vrot.lane.b32.xlu0 %v2691_v27, %s2096_s11  ;;  %v1252_v57 = vpack.i.b16 %v1251_v46, %v1250_v8  ;;  %v982_v9 = vpack.i.b16 %v981_v53, %v980_v44  ;;  %v974_v23 = vshrl.u32 %v934_v63, 16  ;;  %v756_v8 = vrot.slane %v2780_v26, 4 }
 0x194   : > { %822 = vrot.lane.b32.xlu1 %v803_v58, %s2091_s30  ;;  %v970_v58 = vpack.i.b16 %v969_v50, %v968_v35  ;;  %v936_v29 = vsel %vm457_vm1, 0, %v935_v3  ;;  %v964_v40 = vsel %vm457_vm1, 0, %v963_v21  ;;  %v793_v26 = vperm.slane %v785_v22, %v2279_v5 }
 0x196   : > { %v1665_v4 = vpop.permute.xlu0 %1664  ;;  %v796_v31 = vrot.slane %v793_v26, 4  ;;  %v814_v44 = vshrl.u32 %v793_v26, 16 }
 0x197   : > { %v1680_v27 = vsel %vm564_vm6, %v1678_v13, %v1665_v4  ;;  %v766_v4 = vrot.slane %v2802_v30, 4 }
 0x198   : > { %v1682_v43 = vsel %vm567_vm7, %v1680_v27, %v1667_v39  ;;  %v985_v27 = vpack.i.b16 %v964_v40, %v936_v29  ;;  %v797_v32 = vsel %vm457_vm1, 0, %v796_v31 }
 0x199   : > { %v1684_v42 = vsel %vm570_vm8, %v1682_v43, %v1669_v6  ;;  %1263 = vrot.lane.b32.xlu2 %v1246_v2, %s2095_s10  ;;  %v767_v39 = vsel %vm457_vm1, 0, %v766_v4  ;;  %v757_v2 = vsel %vm457_vm1, %v2745_v34, %v756_v8  ;;  %v1205_v43 = vrot.slane %v2834_v61, 4 }
 0x19a   : > { %1686 = vst [vmem:[#allocation2 + $0x20] sm:$0xf] %v1684_v42  ;;  %v807_v42 = vshrl.u32 %v767_v39, 16  ;;  %v765_v24 = vperm.slane %v757_v2, %v2279_v5 }
 0x19b   : > { %1265 = vrot.lane.b32.xlu0 %v1249_v19, %s2090_s14  ;;  %v1233_v19 = vrot.slane %v2842_v18, 4  ;;  %v1206_v62 = vsel %vm457_vm1, 0, %v1205_v43 }
 0x19c   : > { %1267 = vrot.lane.b32.xlu1 %v1252_v57, %s2092_s4  ;;  %v812_v45 = vpack.i.b16 %v793_v26, %v765_v24  ;;  %v1256_v36 = vshrl.u32 %v1206_v62, 16  ;;  %v768_v18 = vrot.slane %v765_v24, 4  ;;  %v813_v35 = vshrl.u32 %v765_v24, 16 }
 0x19d   : > { %v1234_v34 = vsel %vm457_vm1, 0, %v1233_v19 }
 0x19e   : > { %v1255_v61 = vpack.i.b16 %v1234_v34, %v1206_v62  ;;  %v1257_v25 = vshrl.u32 %v1234_v34, 16  ;;  %v769_v53 = vsel %vm457_vm1, 0, %v768_v18 }
 0x19f   : > { %v819_v50 = vshrl.u32 %v769_v53, 16 }
 0x1a0   : > { %v1258_v5 = vpack.i.b16 %v1257_v25, %v1256_v36 }
 0x1a1   : > { %1130 = vrot.lane.b32.xlu2 %v1114_v41, %s2090_s14  ;;  %v1696_v11 = vld [vmem:[#allocation2 + $0x20] sm:$0xf]  ;;  %v975_v41 = vshrl.u32 %v962_v12, 16 }
 0x1a2   : > { %v1714_v33 = vunpack.c.l.b16 %v1696_v11  ;;  %v820_v11 = vshrl.u32 %v797_v32, 16 }
 0x1a3   : > { %1132 = vrot.lane.b32.xlu0 %v2768_v15, %s2092_s4  ;;  %v973_v15 = vpack.i.b16 %v962_v12, %v934_v63  ;;  %v976_v13 = vpack.i.b16 %v975_v41, %v974_v23  ;;  %v815_v63 = vpack.i.b16 %v814_v44, %v813_v35  ;;  %v1389_v41 = vpop.permute.xlu2 %1388 }
 0x1a4   : > { %1134 = vrot.lane.b32.xlu1 %v1120_v28, %s2094_s9  ;;  %v1719_v38 = vpack.c.b16 %v1714_v33, %v1714_v33  ;;  %v795_v28 = vsel %vm457_vm1, 0, %v794_v37  ;;  %v821_v12 = vpack.i.b16 %v820_v11, %v819_v50  ;;  %v986_v33 = vshrl.u32 %v936_v29, 16 }
 0x1a5   : > { %v808_v6 = vshrl.u32 %v795_v28, 16  ;;  %v806_v46 = vpack.i.b16 %v795_v28, %v767_v39  ;;  %v1364_v29 = vpack.i.b16 %v2553_v1, %v2549_v16 }
 0x1a6   : > { %v1729_v54 = vsel %vm423_vm0, %v1719_v38, 0  ;;  %v987_v38 = vshrl.u32 %v964_v40, 16 }
 0x1a7   : > { %1734 = vmatpush.bf16.msra.mxu0 %v1729_v54  ;;  %v809_v57 = vpack.i.b16 %v808_v6, %v807_v42 }
 0x1a8   : > { %v988_v23 = vpack.i.b16 %v987_v38, %v986_v33 }
 0x1a9   : > { %989 = vrot.lane.b32.xlu2 %v970_v58, %s2091_s30  ;;  %v818_v58 = vpack.i.b16 %v797_v32, %v769_v53  ;;  %v1102_v32 = vpack.i.b16 %v2720_v52, %v2668_v55  ;;  %s381_s30 = scalar_lea.vmem %s3031_s3, %s1888_s24 }
 0x1ab   : > { %991 = vrot.lane.b32.xlu0 %v973_v15, %s2093_s5  ;;  %v1526_v54 = vpop.permute.xlu2 %1525 }
 0x1ac   : > { %993 = vrot.lane.b32.xlu1 %v976_v13, %s2095_s10 }
 0x1b1   : > { %824 = vrot.lane.b32.xlu2 %v806_v46, %s2093_s5 }
 0x1b3   : > { %826 = vrot.lane.b32.xlu0 %v809_v57, %s2095_s10 }
 0x1b4   : > { %828 = vrot.lane.b32.xlu1 %v812_v45, %s2090_s14 }
 0x1b9   : > { %1269 = vrot.lane.b32.xlu2 %v1255_v61, %s2094_s9 }
 0x1bb   : > { %1271 = vrot.lane.b32.xlu0 %v1258_v5, %s2096_s11 }
 0x1bc   : > { %997 = vrot.lane.b32.xlu1 %v982_v9, %s2092_s4  ;;  %v1522_v9 = vpop.permute.xlu1 %1521 }
 0x1bd   : > { %v1537_v40 = vsel %vm551_vm2, %v1499_v7, %v1522_v9 }
 0x1c1   : > { %1136 = vrot.lane.b32.xlu2 %v2785_v59, %s2096_s11  ;;  %v1387_v59 = vpop.permute.xlu0 %1386 }
 0x1c2   : > { %v1402_v6 = vsel %vm551_vm2, %v1364_v29, %v1387_v59 }
 0x1c3   : > { %830 = vrot.lane.b32.xlu0 %v815_v63, %s2092_s4  ;;  %v1404_v43 = vsel %vm555_vm3, %v1402_v6, %v1389_v41 }
 0x1c4   : > { %834 = vrot.lane.b32.xlu1 %v821_v12, %s2096_s11  ;;  %v1391_v37 = vpop.permute.xlu1 %1390 }
 0x1c5   : > { %v1406_v10 = vsel %vm558_vm4, %v1404_v43, %v1391_v37 }
 0x1c9   : > { %995 = vrot.lane.b32.xlu2 %v979_v17, %s2090_s14  ;;  %v1524_v15 = vpop.permute.xlu0 %1523 }
 0x1cb   : > { %999 = vrot.lane.b32.xlu0 %v985_v27, %s2094_s9  ;;  %v1539_v27 = vsel %vm555_vm3, %v1537_v40, %v1524_v15 }
 0x1cc   : > { %v1528_v13 = vpop.permute.xlu1 %1527  ;;  %v1541_v26 = vsel %vm558_vm4, %v1539_v27, %v1526_v54 }
 0x1cd   : > { %v1543_v42 = vsel %vm561_vm5, %v1541_v26, %v1528_v13 }
 0x1d1   : > { %832 = vrot.lane.b32.xlu2 %v818_v58, %s2094_s9  ;;  %v1393_v3 = vpop.permute.xlu0 %1392 }
 0x1d2   : > { %v1408_v19 = vsel %vm561_vm5, %v1406_v10, %v1393_v3  ;;  %v1687_v10 = vld [vmem:[%s373_s27] sm:$0xf] }
 0x1d4   : > { %v1395_v21 = vpop.permute.xlu1 %1394 }
 0x1d5   : > { %v1410_v45 = vsel %vm564_vm6, %v1408_v19, %v1395_v21 }
 0x1d9   : > { %1001 = vrot.lane.b32.xlu2 %v988_v23, %s2096_s11 }
 0x1db   : > { %v1125_v47 = vpop.permute.xlu2 %1124 }
 0x1dc   : > { %v1140_v44 = vsel %vm551_vm2, %v1102_v32, %v1125_v47 }
 0x1e3   : > { %v1530_v4 = vpop.permute.xlu2 %1529 }
 0x1e4   : > { %v1545_v16 = vsel %vm564_vm6, %v1543_v42, %v1530_v4 }
 0x1eb   : > { %v1397_v28 = vpop.permute.xlu2 %1396 }
 0x1ec   : > { %v1412_v62 = vsel %vm567_vm7, %v1410_v45, %v1397_v28 }
 0x1ed   : > { %v1260_v8 = vpop.permute.xlu0 %1259 }
 0x1ee   : > { %v1262_v17 = vpop.permute.xlu1 %1261  ;;  %v1275_v9 = vsel %vm551_vm2, %v1237_v60, %v1260_v8  ;;  %v967_v8 = vpack.i.b16 %v2860_v0, %v2857_v51 }
 0x1ef   : > { %v1277_v59 = vsel %vm555_vm3, %v1275_v9, %v1262_v17 }
 0x1f3   : > { %v1264_v22 = vpop.permute.xlu2 %1263 }
 0x1f4   : > { %v1279_v37 = vsel %vm558_vm4, %v1277_v59, %v1264_v22 }
 0x1f5   : > { %v1127_v39 = vpop.permute.xlu0 %1126 }
 0x1f6   : > { %v1129_v2 = vpop.permute.xlu1 %1128  ;;  %v1142_v53 = vsel %vm555_vm3, %v1140_v44, %v1127_v39 }
 0x1f7   : > { %v1144_v50 = vsel %vm558_vm4, %v1142_v53, %v1129_v2 }
 0x1fb   : > { %v1131_v46 = vpop.permute.xlu2 %1130 }
 0x1fc   : > { %v1146_v12 = vsel %vm561_vm5, %v1144_v50, %v1131_v46 }
 0x1fd   : > { %v1532_v1 = vpop.permute.xlu0 %1531 }
 0x1fe   : > { %v1547_v14 = vsel %vm567_vm7, %v1545_v16, %v1532_v1  ;;  %v1534_v7 = vpop.permute.xlu1 %1533  ;;  %v1908_v1 = vld [vmem:[#allocation2] sm:$0xff] }
 0x1ff   : > { %v1549_v24 = vsel %vm570_vm8, %v1547_v14, %v1534_v7 }
 0x200   : > { %1551 = vst [vmem:[#allocation2 + $0x1c] sm:$0xf] %v1549_v24 }
 0x203   : > { %v990_v57 = vpop.permute.xlu2 %989 }
 0x204   : > { %v1005_v30 = vsel %vm551_vm2, %v967_v8, %v990_v57 }
 0x205   : > { %v1399_v34 = vpop.permute.xlu0 %1398 }
 0x206   : > { %v1414_v36 = vsel %vm570_vm8, %v1412_v62, %v1399_v34  ;;  %v823_v61 = vpop.permute.xlu1 %822 }
 0x207   : > { %1416 = vst [vmem:[#allocation2 + $0x18] sm:$0xf] %v1414_v36  ;;  %v838_v56 = vsel %vm551_vm2, %v800_v20, %v823_v61 }
 0x20b   : > { %v825_v25 = vpop.permute.xlu2 %824 }
 0x20c   : > { %v840_v48 = vsel %vm555_vm3, %v838_v56, %v825_v25 }
 0x20d   : > { %v1266_v31 = vpop.permute.xlu0 %1265 }
 0x20e   : > { %v1268_v5 = vpop.permute.xlu1 %1267  ;;  %v1911_v18 = vld [vmem:[#allocation2 + $0x18] sm:$0xff]  ;;  %v1281_v47 = vsel %vm561_vm5, %v1279_v37, %v1266_v31 }
 0x20f   : > { %1735 = vmatpush.bf16.msra.mxu0 %v1911_v18  ;;  %v1283_v13 = vsel %vm564_vm6, %v1281_v47, %v1268_v5 }
 0x213   : > { %v1270_v11 = vpop.permute.xlu2 %1269 }
 0x214   : > { %v1285_v4 = vsel %vm567_vm7, %v1283_v13, %v1270_v11 }
 0x215   : > { %v1133_v35 = vpop.permute.xlu0 %1132 }
 0x216   : > { %v1135_v63 = vpop.permute.xlu1 %1134  ;;  %v1148_v33 = vsel %vm564_vm6, %v1146_v12, %v1133_v35 }
 0x217   : > { %v1150_v38 = vsel %vm567_vm7, %v1148_v33, %v1135_v63 }
 0x21b   : > { %v1137_v23 = vpop.permute.xlu2 %1136 }
 0x21c   : > { %v1152_v41 = vsel %vm570_vm8, %v1150_v38, %v1137_v23 }
 0x21d   : > { %1154 = vst [vmem:[#allocation2 + $0x10] sm:$0xf] %v1152_v41  ;;  %v992_v55 = vpop.permute.xlu0 %991 }
 0x21e   : > { %v994_v52 = vpop.permute.xlu1 %993  ;;  %v1007_v20 = vsel %vm555_vm3, %v1005_v30, %v992_v55 }
 0x21f   : > { %v1009_v51 = vsel %vm558_vm4, %v1007_v20, %v994_v52 }
 0x223   : > { %v996_v15 = vpop.permute.xlu2 %995 }
 0x224   : > { %v1011_v0 = vsel %vm561_vm5, %v1009_v51, %v996_v15 }
 0x225   : > { %v827_v58 = vpop.permute.xlu0 %826 }
 0x226   : > { %v829_v54 = vpop.permute.xlu1 %828  ;;  %v842_v60 = vsel %vm558_vm4, %v840_v48, %v827_v58 }
 0x227   : > { %v844_v22 = vsel %vm561_vm5, %v842_v60, %v829_v54 }
 0x22b   : > { %v833_v17 = vpop.permute.xlu2 %832 }
 0x22d   : > { %v1272_v3 = vpop.permute.xlu0 %1271 }
 0x22e   : > { %v1287_v21 = vsel %vm570_vm8, %v1285_v4, %v1272_v3  ;;  %v998_v28 = vpop.permute.xlu1 %997 }
 0x22f   : > { %1289 = vst [vmem:[#allocation2 + $0x14] sm:$0xf] %v1287_v21  ;;  %v1013_v26 = vsel %vm564_vm6, %v1011_v0, %v998_v28 }
 0x233   : > { %v1002_v6 = vpop.permute.xlu2 %1001 }
 0x235   : > { %v831_v29 = vpop.permute.xlu0 %830 }
 0x236   : > { %v846_v40 = vsel %vm564_vm6, %v844_v22, %v831_v29  ;;  %v835_v39 = vpop.permute.xlu1 %834  ;;  %v1910_v27 = vld [vmem:[#allocation2 + $0x10] sm:$0xff] }
 0x237   : > { %v848_v49 = vsel %vm567_vm7, %v846_v40, %v833_v17  ;;  %1736 = vmatpush.bf16.msra.mxu0 %v1910_v27 }
 0x238   : > { %v850_v2 = vsel %vm570_vm8, %v848_v49, %v835_v39 }
 0x239   : > { %852 = vst [vmem:[#allocation2 + $0x8] sm:$0xf] %v850_v2 }
 0x23d   : > { %v1000_v43 = vpop.permute.xlu0 %999 }
 0x23e   : > { %v1015_v46 = vsel %vm567_vm7, %v1013_v26, %v1000_v43 }
 0x23f   : > { %v1017_v42 = vsel %vm570_vm8, %v1015_v46, %v1002_v6 }
 0x240   : > { %1019 = vst [vmem:[#allocation2 + $0xc] sm:$0xf] %v1017_v42 }
 0x247   : > { %v1909_v16 = vld [vmem:[#allocation2 + $0x8] sm:$0xff] }
 0x248   : > { %1737 = vmatpush.bf16.msra.mxu0 %v1909_v16 }
 0x24c   : > { %1738 = vmatpush.bf16.msra.mxu0 %v1908_v1 }
 0x24f   : > { %1905 = vmatmul.msk.bf16.vlgmr.msra.gmra.mxu0 %vm1724_vm9, %v1687_v10 }
 0x2cc   : > { %v1740_v14 = vpop.f32.mrf.mxu0 }
 0x2cd   : > { %v1744_v7 = vpack.c.bf16 %v1740_v14, %v1740_v14 }
 0x2cf   : > { %1745 = vst [vmem:[%s381_s30] sm:$0xf] %v1744_v7 }
 0x2d4   : > { %v1742_v24 = vpop.f32.mrf.mxu0 }
 0x2d5 PF: > { %s13_s20 = sadd.s32 1, %s2085_s20   ;;  %s3034_s12 = smov %s2057_s13 }
 0x2d6   : > { %p10_p1 = scmp.ge.s32.totalorder %s13_s20, 6   ;;  %s3035_s13 = smov %s2198_s8 }
 0x2d7   : > { %s3036_s14 = smov %s2065_s15  ;;  %s3037_s15 = smov %s2195_s7 }
 0x2d8   : > { %s3038_s16 = smov %s2077_s18  ;;  %s3039_s17 = smov %s2081_s19 }
 0x2d9   : > { %s3040_s18 = smov %s2168_s23  ;;  %s3041_s19 = smov %s3045_s22 }
 0x2da   :  { %12 = sbr.rel (!%p10_p1) target bundleno = 5 (0x5), region = 160 }

</bundles_post_ra>
